<compile_context>
chip_gen: v6e
topology: v6e:2x2x1
jax: 0.10.0
libtpu: 0.0.40
codegen_flags: <defaults>
</compile_context>

<pallas_src>
import numpy as np
import jax
import jax.numpy as jnp
from jax.experimental import pallas as pl
from jax.experimental.pallas import tpu as pltpu

EPS = 1e-5
LRELU_SLOPE = 0.2


def _lrelu(v):
    return jnp.where(v >= 0, v, LRELU_SLOPE * v)


# --------------------------------- kernel ---------------------------------

def _block_kernel(
    x_ref, add_ref,
    w_same_ref, b_same_ref,          # packed mlp_same for norm_s | norm_0 | norm_1
    wgb_s0_ref, bgb_s0_ref,          # packed mlp_gamma|mlp_beta, stacked for norm_s / norm_0
    wgb_1_ref, bgb_1_ref,            # packed mlp_gamma|mlp_beta for norm_1
    ww_s0_ref, bw_s0_ref,            # mlp_weight split into (id-part, x-part), stacked s/0
    ww_1_ref, bw_1_ref,              # mlp_weight for norm_1
    conv_s_w_ref, conv_0_w_ref, conv_0_b_ref, conv_1_w_ref, conv_1_b_ref,
    out_ref,
):
    fin = conv_s_w_ref.shape[1]
    fm = conv_1_w_ref.shape[1]
    L = x_ref.shape[-1]
    var_scale = 1.0 / max(L - 1, 1)      # unbiased variance; guard L == 1

    # Weight loads hoisted out of the batch loop (once per grid step).
    w_same = w_same_ref[...]
    b_same = b_same_ref[...]
    wgb = (wgb_s0_ref[0], wgb_s0_ref[1], wgb_1_ref[...])
    bgb = (bgb_s0_ref[0], bgb_s0_ref[1], bgb_1_ref[...])
    ww_id = (ww_s0_ref[0, 0], ww_s0_ref[1, 0], ww_1_ref[0])
    ww_x = (ww_s0_ref[0, 1], ww_s0_ref[1, 1], ww_1_ref[1])
    bw = (bw_s0_ref[0], bw_s0_ref[1], bw_1_ref[...])
    conv_s_w = conv_s_w_ref[...]
    conv_0_w = conv_0_w_ref[...]
    conv_0_b = conv_0_b_ref[...]
    conv_1_w = conv_1_w_ref[...]
    conv_1_b = conv_1_b_ref[...]

    def elain(xc, x_mean, x_std, x_inv_std, a_c, id_avg, n, C):
        """Folded ElaIN for one (C, L) tile given precomputed x statistics."""
        # one packed (2C, C) @ (C, L) matmul gives gamma- and beta-MLP outputs
        a_gb = jnp.dot(wgb[n], a_c, preferred_element_type=jnp.float32) + bgb[n]
        a_gamma = a_gb[:C]
        a_beta = a_gb[C:]
        # mlp_weight(cat(id_avg, x_avg)) as two tiny matvecs (weights pre-split)
        w = (jnp.dot(ww_id[n], id_avg, preferred_element_type=jnp.float32)
             + jnp.dot(ww_x[n], x_mean, preferred_element_type=jnp.float32) + bw[n])  # (C, 1)
        gamma = a_gamma * w + x_std * (1.0 - w)          # (C, L)
        beta = a_beta * w + x_mean * (1.0 - w)           # (C, L)
        # (x - mean)/std * (1+gamma) + beta, with the divide folded into rsqrt on (C,1)
        return xc * ((1.0 + gamma) * x_inv_std) + beta

    for i in range(x_ref.shape[0]):      # static unroll over batch elements in the block
        x = x_ref[i]                      # (fin, L)
        add = add_ref[i]                  # (ic, L)

        # --- one packed mlp_same matmul feeds all three ElaINs (shared `addition`) ---
        a_all = jnp.dot(w_same, add, preferred_element_type=jnp.float32) + b_same
        a_s, a_0, a_1 = a_all[:fin], a_all[fin:2 * fin], a_all[2 * fin:]

        # --- id_avg via the commuted mean (no (C, L) reductions for it) ---
        add_mean = jnp.mean(add, axis=1, keepdims=True)                    # (ic, 1)
        id_all = jnp.dot(w_same, add_mean, preferred_element_type=jnp.float32) + b_same
        id_s, id_0, id_1 = id_all[:fin], id_all[fin:2 * fin], id_all[2 * fin:]

        # --- x statistics, computed once and shared by norm_s and norm_0 ---
        x_mean = jnp.mean(x, axis=1, keepdims=True)                        # (fin, 1)
        xc = x - x_mean
        x_var = jnp.sum(xc * xc, axis=1, keepdims=True) * var_scale + EPS
        x_std = jnp.sqrt(x_var)
        x_inv = jax.lax.rsqrt(x_var)

        # shortcut branch: conv_s(actvn(norm_s(x, addition)))
        hs = elain(xc, x_mean, x_std, x_inv, a_s, id_s, 0, fin)
        x_s = jnp.dot(conv_s_w, _lrelu(hs), preferred_element_type=jnp.float32)

        # main branch: conv_0(actvn(norm_0(x, addition)))
        h0 = elain(xc, x_mean, x_std, x_inv, a_0, id_0, 1, fin)
        dx = jnp.dot(conv_0_w, _lrelu(h0), preferred_element_type=jnp.float32) + conv_0_b

        # conv_1(actvn(norm_1(dx, addition)))  -- dx needs its own statistics
        d_mean = jnp.mean(dx, axis=1, keepdims=True)
        dc = dx - d_mean
        d_var = jnp.sum(dc * dc, axis=1, keepdims=True) * var_scale + EPS
        d_std = jnp.sqrt(d_var)
        d_inv = jax.lax.rsqrt(d_var)

        h1 = elain(dc, d_mean, d_std, d_inv, a_1, id_1, 2, fm)
        dx2 = jnp.dot(conv_1_w, _lrelu(h1), preferred_element_type=jnp.float32) + conv_1_b

        out_ref[i] = (x_s + dx2).astype(out_ref.dtype)


# --------------------------------- wrapper ---------------------------------

_WEIGHT_ORDER = ("w_same", "b_same", "wgb_s0", "bgb_s0", "wgb_1", "bgb_1",
                 "ww_s0", "bw_s0", "ww_1", "bw_1",
                 "conv_s_w", "conv_0_w", "conv_0_b", "conv_1_w", "conv_1_b")


def elain_resnet_block(x_ncl, add_ncl, packed, *, block_n=1):
    """x_ncl: (N, fin, L), add_ncl: (N, ic, L) in PyTorch NCL layout (float32)."""
    N, fin, L = x_ncl.shape
    ic = add_ncl.shape[1]
    fout = packed["conv_s_w"].shape[0]
    assert N % block_n == 0, "block_n must divide the batch"

    weights = tuple(packed[k] for k in _WEIGHT_ORDER)

    def full_spec(a):
        nd = a.ndim
        return pl.BlockSpec(a.shape, lambda b, _nd=nd: (0,) * _nd)

    in_specs = ([pl.BlockSpec((block_n, fin, L), lambda b: (b, 0, 0)),
                 pl.BlockSpec((block_n, ic, L), lambda b: (b, 0, 0))]
                + [full_spec(a) for a in weights])
    out_specs = pl.BlockSpec((block_n, fout, L), lambda b: (b, 0, 0))

    return pl.pallas_call(
        _block_kernel,
        out_shape=jax.ShapeDtypeStruct((N, fout, L), jnp.float32),
        grid=(N // block_n,),
        in_specs=in_specs,
        out_specs=out_specs,
        compiler_params=pltpu.CompilerParams(dimension_semantics=("parallel",)),
    )(x_ncl, add_ncl, *weights)


# -------------------- parameters (deterministic, synthetic) --------------------

def _make_elain_params(key, norm_nc, addition_nc, scale=0.2):
    ks = jax.random.split(key, 8)
    w = lambda k, s: scale * jax.random.normal(k, s, jnp.float32)
    return dict(
        ws=w(ks[0], (norm_nc, addition_nc)), bs=w(ks[1], (norm_nc, 1)),   # mlp_same
        wg=w(ks[2], (norm_nc, norm_nc)),     bg=w(ks[3], (norm_nc, 1)),   # mlp_gamma
        wb=w(ks[4], (norm_nc, norm_nc)),     bb=w(ks[5], (norm_nc, 1)),   # mlp_beta
        ww=w(ks[6], (norm_nc, 2 * norm_nc)), bw=w(ks[7], (norm_nc, 1)),   # mlp_weight
    )


def make_params(key, fin, fout, ic):
    fm = min(fin, fout)
    ks = jax.random.split(key, 8)
    w = lambda k, s: 0.2 * jax.random.normal(k, s, jnp.float32)
    # spectral_norm: torch uses a power-iteration sigma estimate; here the exact largest
    # singular value is applied once at parameter-setup time (plain JAX glue).
    sn = lambda m: m / jnp.linalg.norm(m, ord=2)
    return dict(
        norm_s=_make_elain_params(ks[0], fin, ic),
        norm_0=_make_elain_params(ks[1], fin, ic),
        norm_1=_make_elain_params(ks[2], fm, ic),
        conv_s_w=sn(w(ks[3], (fout, fin))),       # Conv1d(fin, fout, 1, bias=False)
        conv_0_w=sn(w(ks[4], (fm, fin))),         # Conv1d(fin, fmiddle, 1)
        conv_0_b=w(ks[5], (fm, 1)),
        conv_1_w=sn(w(ks[6], (fout, fm))),        # Conv1d(fmiddle, fout, 1)
        conv_1_b=w(ks[7], (fout, 1)),
    )


def pack_params(P):
    """One-time packing of the 33 raw tensors into 15 kernel operands."""
    ns, n0, n1 = P["norm_s"], P["norm_0"], P["norm_1"]
    fin = ns["ws"].shape[0]
    fm = n1["ws"].shape[0]
    w_same = jnp.concatenate([ns["ws"], n0["ws"], n1["ws"]], axis=0)     # (2*fin+fm, ic)
    b_same = jnp.concatenate([ns["bs"], n0["bs"], n1["bs"]], axis=0)     # (2*fin+fm, 1)
    wgb_s0 = jnp.stack([jnp.concatenate([ns["wg"], ns["wb"]], axis=0),
                        jnp.concatenate([n0["wg"], n0["wb"]], axis=0)])  # (2, 2*fin, fin)
    bgb_s0 = jnp.stack([jnp.concatenate([ns["bg"], ns["bb"]], axis=0),
                        jnp.concatenate([n0["bg"], n0["bb"]], axis=0)])  # (2, 2*fin, 1)
    wgb_1 = jnp.concatenate([n1["wg"], n1["wb"]], axis=0)                # (2*fm, fm)
    bgb_1 = jnp.concatenate([n1["bg"], n1["bb"]], axis=0)                # (2*fm, 1)
    # mlp_weight split into the id-part ([:, :C]) and x-part ([:, C:]) columns
    ww_s0 = jnp.stack([jnp.stack([ns["ww"][:, :fin], ns["ww"][:, fin:]]),
                       jnp.stack([n0["ww"][:, :fin], n0["ww"][:, fin:]])])  # (2, 2, fin, fin)
    bw_s0 = jnp.stack([ns["bw"], n0["bw"]])                                 # (2, fin, 1)
    ww_1 = jnp.stack([n1["ww"][:, :fm], n1["ww"][:, fm:]])                  # (2, fm, fm)
    bw_1 = n1["bw"]                                                         # (fm, 1)
    return dict(w_same=w_same, b_same=b_same, wgb_s0=wgb_s0, bgb_s0=bgb_s0,
                wgb_1=wgb_1, bgb_1=bgb_1, ww_s0=ww_s0, bw_s0=bw_s0,
                ww_1=ww_1, bw_1=bw_1,
                conv_s_w=P["conv_s_w"], conv_0_w=P["conv_0_w"], conv_0_b=P["conv_0_b"],
                conv_1_w=P["conv_1_w"], conv_1_b=P["conv_1_b"])


# ----------------- pure-JAX reference (unfused, mirrors PyTorch) -----------------

def _elain_ref(x, add, p):
    a = p["ws"] @ add + p["bs"]
    a_gamma = p["wg"] @ a + p["bg"]
    a_beta = p["wb"] @ a + p["bb"]
    id_avg = jnp.mean(a, axis=1, keepdims=True)
    x_avg = jnp.mean(x, axis=1, keepdims=True)
    weight = p["ww"] @ jnp.concatenate([id_avg, x_avg], axis=0) + p["bw"]
    x_var = jnp.var(x, axis=1, keepdims=True, ddof=1) + EPS
    x_std = jnp.sqrt(x_var)
    gamma = a_gamma * weight + x_std * (1.0 - weight)
    beta = a_beta * weight + x_avg * (1.0 - weight)
    xn = (x - x_avg) / x_std
    return xn * (1.0 + gamma) + beta


def _block_ref(x, add, P):
    hs = _elain_ref(x, add, P["norm_s"])
    x_s = P["conv_s_w"] @ _lrelu(hs)
    h0 = _elain_ref(x, add, P["norm_0"])
    dx = P["conv_0_w"] @ _lrelu(h0) + P["conv_0_b"]
    h1 = _elain_ref(dx, add, P["norm_1"])
    dx = P["conv_1_w"] @ _lrelu(h1) + P["conv_1_b"]
    return x_s + dx


if __name__ == "__main__":
    N, L, fin, fout, ic = 2, 16, 32, 16, 8       # fmiddle = min(fin, fout) = 16
    key = jax.random.PRNGKey(0)
    k_x, k_a, k_p = jax.random.split(key, 3)

    x = jax.random.normal(k_x, (N, fin, L), jnp.float32)          # PyTorch NCL input
    addition = jax.random.normal(k_a, (N, ic, L), jnp.float32)    # PyTorch NCL input
    raw = make_params(k_p, fin, fout, ic)
    packed = pack_params(raw)                    # one-time parameter packing

    # block_n=1 keeps 2 parallel grid steps (good for v7x's 2 TensorCores);
    # raise block_n to amortize per-step overhead when L is small.
    out = elain_resnet_block(x, addition, packed, block_n=1)
    out = jax.block_until_ready(out)
    assert out.shape == (N, fout, L)

    # correctness check vs. unfused pure-JAX reference (validates all algebraic rewrites)
    ref = jax.vmap(lambda xv, av: _block_ref(xv, av, raw))(x, addition)
    np.testing.assert_allclose(np.asarray(out), np.asarray(ref), rtol=2e-2, atol=2e-2)

    print("KERNEL_OK")
</pallas_src>

<mosaic_0001>
module attributes {stable_mosaic.version = 11 : i64} {
  func.func @_block_kernel(%arg0: i32, %arg1: memref<1x32x16xf32, #tpu.memory_space<vmem>>, %arg2: memref<1x8x16xf32, #tpu.memory_space<vmem>>, %arg3: memref<80x8xf32, #tpu.memory_space<vmem>>, %arg4: memref<80x1xf32, #tpu.memory_space<vmem>>, %arg5: memref<2x64x32xf32, #tpu.memory_space<vmem>>, %arg6: memref<2x64x1xf32, #tpu.memory_space<vmem>>, %arg7: memref<32x16xf32, #tpu.memory_space<vmem>>, %arg8: memref<32x1xf32, #tpu.memory_space<vmem>>, %arg9: memref<2x2x32x32xf32, #tpu.memory_space<vmem>>, %arg10: memref<2x32x1xf32, #tpu.memory_space<vmem>>, %arg11: memref<2x16x16xf32, #tpu.memory_space<vmem>>, %arg12: memref<16x1xf32, #tpu.memory_space<vmem>>, %arg13: memref<16x32xf32, #tpu.memory_space<vmem>>, %arg14: memref<16x32xf32, #tpu.memory_space<vmem>>, %arg15: memref<16x1xf32, #tpu.memory_space<vmem>>, %arg16: memref<16x16xf32, #tpu.memory_space<vmem>>, %arg17: memref<16x1xf32, #tpu.memory_space<vmem>>, %arg18: memref<1x16x16xf32, #tpu.memory_space<vmem>>) attributes {dimension_semantics = [#tpu.dimension_semantics<parallel>], iteration_bounds = array<i64: 2>, scalar_prefetch = 0 : i64, scratch_operands = 0 : i64, tpu.core_type = #tpu.core_type<tc>, window_params = [{transform_indices = @transform_0, window_bounds = array<i64: 1, 32, 16>}, {transform_indices = @transform_1, window_bounds = array<i64: 1, 8, 16>}, {pipeline_mode = #tpu.pipeline_mode<synchronous>, transform_indices = @transform_2, window_bounds = array<i64: 80, 8>}, {pipeline_mode = #tpu.pipeline_mode<synchronous>, transform_indices = @transform_3, window_bounds = array<i64: 80, 1>}, {pipeline_mode = #tpu.pipeline_mode<synchronous>, transform_indices = @transform_4, window_bounds = array<i64: 2, 64, 32>}, {pipeline_mode = #tpu.pipeline_mode<synchronous>, transform_indices = @transform_5, window_bounds = array<i64: 2, 64, 1>}, {pipeline_mode = #tpu.pipeline_mode<synchronous>, transform_indices = @transform_6, window_bounds = array<i64: 32, 16>}, {pipeline_mode = #tpu.pipeline_mode<synchronous>, transform_indices = @transform_7, window_bounds = array<i64: 32, 1>}, {pipeline_mode = #tpu.pipeline_mode<synchronous>, transform_indices = @transform_8, window_bounds = array<i64: 2, 2, 32, 32>}, {pipeline_mode = #tpu.pipeline_mode<synchronous>, transform_indices = @transform_9, window_bounds = array<i64: 2, 32, 1>}, {pipeline_mode = #tpu.pipeline_mode<synchronous>, transform_indices = @transform_10, window_bounds = array<i64: 2, 16, 16>}, {pipeline_mode = #tpu.pipeline_mode<synchronous>, transform_indices = @transform_11, window_bounds = array<i64: 16, 1>}, {pipeline_mode = #tpu.pipeline_mode<synchronous>, transform_indices = @transform_12, window_bounds = array<i64: 16, 32>}, {pipeline_mode = #tpu.pipeline_mode<synchronous>, transform_indices = @transform_13, window_bounds = array<i64: 16, 32>}, {pipeline_mode = #tpu.pipeline_mode<synchronous>, transform_indices = @transform_14, window_bounds = array<i64: 16, 1>}, {pipeline_mode = #tpu.pipeline_mode<synchronous>, transform_indices = @transform_15, window_bounds = array<i64: 16, 16>}, {pipeline_mode = #tpu.pipeline_mode<synchronous>, transform_indices = @transform_16, window_bounds = array<i64: 16, 1>}, {transform_indices = @transform_17, window_bounds = array<i64: 1, 16, 16>}]} {
    %c0 = arith.constant 0 : index
    %c0_0 = arith.constant 0 : index
    %0 = vector.load %arg3[%c0, %c0_0] : memref<80x8xf32, #tpu.memory_space<vmem>>, vector<80x8xf32>
    %c0_1 = arith.constant 0 : index
    %c0_2 = arith.constant 0 : index
    %1 = vector.load %arg4[%c0_1, %c0_2] : memref<80x1xf32, #tpu.memory_space<vmem>>, vector<80x1xf32>
    %c0_3 = arith.constant 0 : index
    %c0_4 = arith.constant 0 : index
    %c0_5 = arith.constant 0 : index
    %2 = vector.load %arg5[%c0_3, %c0_4, %c0_5] : memref<2x64x32xf32, #tpu.memory_space<vmem>>, vector<1x64x32xf32>
    %3 = vector.shape_cast %2 : vector<1x64x32xf32> to vector<64x32xf32>
    %c1 = arith.constant 1 : index
    %c0_6 = arith.constant 0 : index
    %c0_7 = arith.constant 0 : index
    %4 = vector.load %arg5[%c1, %c0_6, %c0_7] : memref<2x64x32xf32, #tpu.memory_space<vmem>>, vector<1x64x32xf32>
    %5 = vector.shape_cast %4 : vector<1x64x32xf32> to vector<64x32xf32>
    %c0_8 = arith.constant 0 : index
    %c0_9 = arith.constant 0 : index
    %6 = vector.load %arg7[%c0_8, %c0_9] : memref<32x16xf32, #tpu.memory_space<vmem>>, vector<32x16xf32>
    %c0_10 = arith.constant 0 : index
    %c0_11 = arith.constant 0 : index
    %c0_12 = arith.constant 0 : index
    %7 = vector.load %arg6[%c0_10, %c0_11, %c0_12] : memref<2x64x1xf32, #tpu.memory_space<vmem>>, vector<1x64x1xf32>
    %8 = vector.shape_cast %7 : vector<1x64x1xf32> to vector<64x1xf32>
    %c1_13 = arith.constant 1 : index
    %c0_14 = arith.constant 0 : index
    %c0_15 = arith.constant 0 : index
    %9 = vector.load %arg6[%c1_13, %c0_14, %c0_15] : memref<2x64x1xf32, #tpu.memory_space<vmem>>, vector<1x64x1xf32>
    %10 = vector.shape_cast %9 : vector<1x64x1xf32> to vector<64x1xf32>
    %c0_16 = arith.constant 0 : index
    %c0_17 = arith.constant 0 : index
    %11 = vector.load %arg8[%c0_16, %c0_17] : memref<32x1xf32, #tpu.memory_space<vmem>>, vector<32x1xf32>
    %c0_18 = arith.constant 0 : index
    %c0_19 = arith.constant 0 : index
    %c0_20 = arith.constant 0 : index
    %c0_21 = arith.constant 0 : index
    %12 = vector.load %arg9[%c0_18, %c0_19, %c0_20, %c0_21] : memref<2x2x32x32xf32, #tpu.memory_space<vmem>>, vector<1x1x32x32xf32>
    %13 = vector.shape_cast %12 : vector<1x1x32x32xf32> to vector<32x32xf32>
    %c1_22 = arith.constant 1 : index
    %c0_23 = arith.constant 0 : index
    %c0_24 = arith.constant 0 : index
    %c0_25 = arith.constant 0 : index
    %14 = vector.load %arg9[%c1_22, %c0_23, %c0_24, %c0_25] : memref<2x2x32x32xf32, #tpu.memory_space<vmem>>, vector<1x1x32x32xf32>
    %15 = vector.shape_cast %14 : vector<1x1x32x32xf32> to vector<32x32xf32>
    %c0_26 = arith.constant 0 : index
    %c0_27 = arith.constant 0 : index
    %c0_28 = arith.constant 0 : index
    %16 = vector.load %arg11[%c0_26, %c0_27, %c0_28] : memref<2x16x16xf32, #tpu.memory_space<vmem>>, vector<1x16x16xf32>
    %17 = vector.shape_cast %16 : vector<1x16x16xf32> to vector<16x16xf32>
    %c0_29 = arith.constant 0 : index
    %c1_30 = arith.constant 1 : index
    %c0_31 = arith.constant 0 : index
    %c0_32 = arith.constant 0 : index
    %18 = vector.load %arg9[%c0_29, %c1_30, %c0_31, %c0_32] : memref<2x2x32x32xf32, #tpu.memory_space<vmem>>, vector<1x1x32x32xf32>
    %19 = vector.shape_cast %18 : vector<1x1x32x32xf32> to vector<32x32xf32>
    %c1_33 = arith.constant 1 : index
    %c1_34 = arith.constant 1 : index
    %c0_35 = arith.constant 0 : index
    %c0_36 = arith.constant 0 : index
    %20 = vector.load %arg9[%c1_33, %c1_34, %c0_35, %c0_36] : memref<2x2x32x32xf32, #tpu.memory_space<vmem>>, vector<1x1x32x32xf32>
    %21 = vector.shape_cast %20 : vector<1x1x32x32xf32> to vector<32x32xf32>
    %c1_37 = arith.constant 1 : index
    %c0_38 = arith.constant 0 : index
    %c0_39 = arith.constant 0 : index
    %22 = vector.load %arg11[%c1_37, %c0_38, %c0_39] : memref<2x16x16xf32, #tpu.memory_space<vmem>>, vector<1x16x16xf32>
    %23 = vector.shape_cast %22 : vector<1x16x16xf32> to vector<16x16xf32>
    %c0_40 = arith.constant 0 : index
    %c0_41 = arith.constant 0 : index
    %c0_42 = arith.constant 0 : index
    %24 = vector.load %arg10[%c0_40, %c0_41, %c0_42] : memref<2x32x1xf32, #tpu.memory_space<vmem>>, vector<1x32x1xf32>
    %25 = vector.shape_cast %24 : vector<1x32x1xf32> to vector<32x1xf32>
    %c1_43 = arith.constant 1 : index
    %c0_44 = arith.constant 0 : index
    %c0_45 = arith.constant 0 : index
    %26 = vector.load %arg10[%c1_43, %c0_44, %c0_45] : memref<2x32x1xf32, #tpu.memory_space<vmem>>, vector<1x32x1xf32>
    %27 = vector.shape_cast %26 : vector<1x32x1xf32> to vector<32x1xf32>
    %c0_46 = arith.constant 0 : index
    %c0_47 = arith.constant 0 : index
    %28 = vector.load %arg12[%c0_46, %c0_47] : memref<16x1xf32, #tpu.memory_space<vmem>>, vector<16x1xf32>
    %c0_48 = arith.constant 0 : index
    %c0_49 = arith.constant 0 : index
    %29 = vector.load %arg13[%c0_48, %c0_49] : memref<16x32xf32, #tpu.memory_space<vmem>>, vector<16x32xf32>
    %c0_50 = arith.constant 0 : index
    %c0_51 = arith.constant 0 : index
    %30 = vector.load %arg14[%c0_50, %c0_51] : memref<16x32xf32, #tpu.memory_space<vmem>>, vector<16x32xf32>
    %c0_52 = arith.constant 0 : index
    %c0_53 = arith.constant 0 : index
    %31 = vector.load %arg15[%c0_52, %c0_53] : memref<16x1xf32, #tpu.memory_space<vmem>>, vector<16x1xf32>
    %c0_54 = arith.constant 0 : index
    %c0_55 = arith.constant 0 : index
    %32 = vector.load %arg16[%c0_54, %c0_55] : memref<16x16xf32, #tpu.memory_space<vmem>>, vector<16x16xf32>
    %c0_56 = arith.constant 0 : index
    %c0_57 = arith.constant 0 : index
    %33 = vector.load %arg17[%c0_56, %c0_57] : memref<16x1xf32, #tpu.memory_space<vmem>>, vector<16x1xf32>
    %c0_58 = arith.constant 0 : index
    %c0_59 = arith.constant 0 : index
    %c0_60 = arith.constant 0 : index
    %34 = vector.load %arg1[%c0_58, %c0_59, %c0_60] : memref<1x32x16xf32, #tpu.memory_space<vmem>>, vector<1x32x16xf32>
    %35 = vector.shape_cast %34 : vector<1x32x16xf32> to vector<32x16xf32>
    %c0_61 = arith.constant 0 : index
    %c0_62 = arith.constant 0 : index
    %c0_63 = arith.constant 0 : index
    %36 = vector.load %arg2[%c0_61, %c0_62, %c0_63] : memref<1x8x16xf32, #tpu.memory_space<vmem>>, vector<1x8x16xf32>
    %37 = vector.shape_cast %36 : vector<1x8x16xf32> to vector<8x16xf32>
    %cst = arith.constant dense<0.000000e+00> : vector<80x16xf32>
    %38 = tpu.matmul %0, %37, %cst {dimension_numbers = #tpu.dot_dimension_numbers<[1], [0], [0], [1], [0, 0, 1, 1], [], []>} : vector<80x8xf32>, vector<8x16xf32>, vector<80x16xf32> -> vector<80x16xf32>
    %39 = vector.broadcast %1 : vector<80x1xf32> to vector<80x16xf32>
    %40 = arith.addf %38, %39 : vector<80x16xf32>
    %41 = vector.extract_strided_slice %40 {offsets = [0, 0], sizes = [32, 16], strides = [1, 1]} : vector<80x16xf32> to vector<32x16xf32>
    %42 = vector.extract_strided_slice %40 {offsets = [32, 0], sizes = [32, 16], strides = [1, 1]} : vector<80x16xf32> to vector<32x16xf32>
    %43 = vector.extract_strided_slice %40 {offsets = [64, 0], sizes = [16, 16], strides = [1, 1]} : vector<80x16xf32> to vector<16x16xf32>
    %cst_64 = arith.constant dense<0.000000e+00> : vector<8xf32>
    %44 = vector.multi_reduction <add>, %37, %cst_64 [1] : vector<8x16xf32> to vector<8xf32>
    %45 = vector.shape_cast %44 : vector<8xf32> to vector<8x1xf32>
    %cst_65 = arith.constant 1.600000e+01 : f32
    %46 = vector.broadcast %cst_65 : f32 to vector<8x1xf32>
    %47 = arith.divf %45, %46 : vector<8x1xf32>
    %cst_66 = arith.constant dense<0.000000e+00> : vector<80x1xf32>
    %48 = tpu.matmul %0, %47, %cst_66 {dimension_numbers = #tpu.dot_dimension_numbers<[1], [0], [0], [1], [0, 0, 1, 1], [], []>} : vector<80x8xf32>, vector<8x1xf32>, vector<80x1xf32> -> vector<80x1xf32>
    %49 = arith.addf %48, %1 : vector<80x1xf32>
    %50 = vector.extract_strided_slice %49 {offsets = [0, 0], sizes = [32, 1], strides = [1, 1]} : vector<80x1xf32> to vector<32x1xf32>
    %51 = vector.extract_strided_slice %49 {offsets = [32, 0], sizes = [32, 1], strides = [1, 1]} : vector<80x1xf32> to vector<32x1xf32>
    %52 = vector.extract_strided_slice %49 {offsets = [64, 0], sizes = [16, 1], strides = [1, 1]} : vector<80x1xf32> to vector<16x1xf32>
    %cst_67 = arith.constant dense<0.000000e+00> : vector<32xf32>
    %53 = vector.multi_reduction <add>, %35, %cst_67 [1] : vector<32x16xf32> to vector<32xf32>
    %54 = vector.shape_cast %53 : vector<32xf32> to vector<32x1xf32>
    %cst_68 = arith.constant 1.600000e+01 : f32
    %55 = vector.broadcast %cst_68 : f32 to vector<32x1xf32>
    %56 = arith.divf %54, %55 : vector<32x1xf32>
    %57 = vector.broadcast %56 : vector<32x1xf32> to vector<32x16xf32>
    %58 = arith.subf %35, %57 : vector<32x16xf32>
    %59 = arith.mulf %58, %58 : vector<32x16xf32>
    %cst_69 = arith.constant dense<0.000000e+00> : vector<32xf32>
    %60 = vector.multi_reduction <add>, %59, %cst_69 [1] : vector<32x16xf32> to vector<32xf32>
    %61 = vector.shape_cast %60 : vector<32xf32> to vector<32x1xf32>
    %cst_70 = arith.constant 0.0666666701 : f32
    %62 = vector.broadcast %cst_70 : f32 to vector<32x1xf32>
    %63 = arith.mulf %61, %62 : vector<32x1xf32>
    %cst_71 = arith.constant 9.99999974E-6 : f32
    %64 = vector.broadcast %cst_71 : f32 to vector<32x1xf32>
    %65 = arith.addf %63, %64 : vector<32x1xf32>
    %66 = math.sqrt %65 : vector<32x1xf32>
    %67 = math.rsqrt %65 : vector<32x1xf32>
    %cst_72 = arith.constant dense<0.000000e+00> : vector<64x16xf32>
    %68 = tpu.matmul %3, %41, %cst_72 {dimension_numbers = #tpu.dot_dimension_numbers<[1], [0], [0], [1], [0, 0, 1, 1], [], []>} : vector<64x32xf32>, vector<32x16xf32>, vector<64x16xf32> -> vector<64x16xf32>
    %69 = vector.broadcast %8 : vector<64x1xf32> to vector<64x16xf32>
    %70 = arith.addf %68, %69 : vector<64x16xf32>
    %71 = vector.extract_strided_slice %70 {offsets = [0, 0], sizes = [32, 16], strides = [1, 1]} : vector<64x16xf32> to vector<32x16xf32>
    %72 = vector.extract_strided_slice %70 {offsets = [32, 0], sizes = [32, 16], strides = [1, 1]} : vector<64x16xf32> to vector<32x16xf32>
    %cst_73 = arith.constant dense<0.000000e+00> : vector<32x1xf32>
    %73 = tpu.matmul %13, %50, %cst_73 {dimension_numbers = #tpu.dot_dimension_numbers<[1], [0], [0], [1], [0, 0, 1, 1], [], []>} : vector<32x32xf32>, vector<32x1xf32>, vector<32x1xf32> -> vector<32x1xf32>
    %cst_74 = arith.constant dense<0.000000e+00> : vector<32x1xf32>
    %74 = tpu.matmul %19, %56, %cst_74 {dimension_numbers = #tpu.dot_dimension_numbers<[1], [0], [0], [1], [0, 0, 1, 1], [], []>} : vector<32x32xf32>, vector<32x1xf32>, vector<32x1xf32> -> vector<32x1xf32>
    %75 = arith.addf %73, %74 : vector<32x1xf32>
    %76 = arith.addf %75, %25 : vector<32x1xf32>
    %77 = vector.broadcast %76 : vector<32x1xf32> to vector<32x16xf32>
    %78 = arith.mulf %71, %77 : vector<32x16xf32>
    %cst_75 = arith.constant 1.000000e+00 : f32
    %79 = vector.broadcast %cst_75 : f32 to vector<32x1xf32>
    %80 = arith.subf %79, %76 : vector<32x1xf32>
    %81 = arith.mulf %66, %80 : vector<32x1xf32>
    %82 = vector.broadcast %81 : vector<32x1xf32> to vector<32x16xf32>
    %83 = arith.addf %78, %82 : vector<32x16xf32>
    %84 = vector.broadcast %76 : vector<32x1xf32> to vector<32x16xf32>
    %85 = arith.mulf %72, %84 : vector<32x16xf32>
    %cst_76 = arith.constant 1.000000e+00 : f32
    %86 = vector.broadcast %cst_76 : f32 to vector<32x1xf32>
    %87 = arith.subf %86, %76 : vector<32x1xf32>
    %88 = arith.mulf %56, %87 : vector<32x1xf32>
    %89 = vector.broadcast %88 : vector<32x1xf32> to vector<32x16xf32>
    %90 = arith.addf %85, %89 : vector<32x16xf32>
    %cst_77 = arith.constant 1.000000e+00 : f32
    %91 = vector.broadcast %cst_77 : f32 to vector<32x16xf32>
    %92 = arith.addf %91, %83 : vector<32x16xf32>
    %93 = vector.broadcast %67 : vector<32x1xf32> to vector<32x16xf32>
    %94 = arith.mulf %92, %93 : vector<32x16xf32>
    %95 = arith.mulf %58, %94 : vector<32x16xf32>
    %96 = arith.addf %95, %90 : vector<32x16xf32>
    %cst_78 = arith.constant 0.000000e+00 : f32
    %97 = vector.broadcast %cst_78 : f32 to vector<32x16xf32>
    %98 = arith.cmpf oge, %96, %97 : vector<32x16xf32>
    %cst_79 = arith.constant 2.000000e-01 : f32
    %99 = vector.broadcast %cst_79 : f32 to vector<32x16xf32>
    %100 = arith.mulf %99, %96 : vector<32x16xf32>
    %101 = arith.select %98, %96, %100 : vector<32x16xi1>, vector<32x16xf32>
    %cst_80 = arith.constant dense<0.000000e+00> : vector<16x16xf32>
    %102 = tpu.matmul %29, %101, %cst_80 {dimension_numbers = #tpu.dot_dimension_numbers<[1], [0], [0], [1], [0, 0, 1, 1], [], []>} : vector<16x32xf32>, vector<32x16xf32>, vector<16x16xf32> -> vector<16x16xf32>
    %cst_81 = arith.constant dense<0.000000e+00> : vector<64x16xf32>
    %103 = tpu.matmul %5, %42, %cst_81 {dimension_numbers = #tpu.dot_dimension_numbers<[1], [0], [0], [1], [0, 0, 1, 1], [], []>} : vector<64x32xf32>, vector<32x16xf32>, vector<64x16xf32> -> vector<64x16xf32>
    %104 = vector.broadcast %10 : vector<64x1xf32> to vector<64x16xf32>
    %105 = arith.addf %103, %104 : vector<64x16xf32>
    %106 = vector.extract_strided_slice %105 {offsets = [0, 0], sizes = [32, 16], strides = [1, 1]} : vector<64x16xf32> to vector<32x16xf32>
    %107 = vector.extract_strided_slice %105 {offsets = [32, 0], sizes = [32, 16], strides = [1, 1]} : vector<64x16xf32> to vector<32x16xf32>
    %cst_82 = arith.constant dense<0.000000e+00> : vector<32x1xf32>
    %108 = tpu.matmul %15, %51, %cst_82 {dimension_numbers = #tpu.dot_dimension_numbers<[1], [0], [0], [1], [0, 0, 1, 1], [], []>} : vector<32x32xf32>, vector<32x1xf32>, vector<32x1xf32> -> vector<32x1xf32>
    %cst_83 = arith.constant dense<0.000000e+00> : vector<32x1xf32>
    %109 = tpu.matmul %21, %56, %cst_83 {dimension_numbers = #tpu.dot_dimension_numbers<[1], [0], [0], [1], [0, 0, 1, 1], [], []>} : vector<32x32xf32>, vector<32x1xf32>, vector<32x1xf32> -> vector<32x1xf32>
    %110 = arith.addf %108, %109 : vector<32x1xf32>
    %111 = arith.addf %110, %27 : vector<32x1xf32>
    %112 = vector.broadcast %111 : vector<32x1xf32> to vector<32x16xf32>
    %113 = arith.mulf %106, %112 : vector<32x16xf32>
    %cst_84 = arith.constant 1.000000e+00 : f32
    %114 = vector.broadcast %cst_84 : f32 to vector<32x1xf32>
    %115 = arith.subf %114, %111 : vector<32x1xf32>
    %116 = arith.mulf %66, %115 : vector<32x1xf32>
    %117 = vector.broadcast %116 : vector<32x1xf32> to vector<32x16xf32>
    %118 = arith.addf %113, %117 : vector<32x16xf32>
    %119 = vector.broadcast %111 : vector<32x1xf32> to vector<32x16xf32>
    %120 = arith.mulf %107, %119 : vector<32x16xf32>
    %cst_85 = arith.constant 1.000000e+00 : f32
    %121 = vector.broadcast %cst_85 : f32 to vector<32x1xf32>
    %122 = arith.subf %121, %111 : vector<32x1xf32>
    %123 = arith.mulf %56, %122 : vector<32x1xf32>
    %124 = vector.broadcast %123 : vector<32x1xf32> to vector<32x16xf32>
    %125 = arith.addf %120, %124 : vector<32x16xf32>
    %cst_86 = arith.constant 1.000000e+00 : f32
    %126 = vector.broadcast %cst_86 : f32 to vector<32x16xf32>
    %127 = arith.addf %126, %118 : vector<32x16xf32>
    %128 = vector.broadcast %67 : vector<32x1xf32> to vector<32x16xf32>
    %129 = arith.mulf %127, %128 : vector<32x16xf32>
    %130 = arith.mulf %58, %129 : vector<32x16xf32>
    %131 = arith.addf %130, %125 : vector<32x16xf32>
    %cst_87 = arith.constant 0.000000e+00 : f32
    %132 = vector.broadcast %cst_87 : f32 to vector<32x16xf32>
    %133 = arith.cmpf oge, %131, %132 : vector<32x16xf32>
    %cst_88 = arith.constant 2.000000e-01 : f32
    %134 = vector.broadcast %cst_88 : f32 to vector<32x16xf32>
    %135 = arith.mulf %134, %131 : vector<32x16xf32>
    %136 = arith.select %133, %131, %135 : vector<32x16xi1>, vector<32x16xf32>
    %cst_89 = arith.constant dense<0.000000e+00> : vector<16x16xf32>
    %137 = tpu.matmul %30, %136, %cst_89 {dimension_numbers = #tpu.dot_dimension_numbers<[1], [0], [0], [1], [0, 0, 1, 1], [], []>} : vector<16x32xf32>, vector<32x16xf32>, vector<16x16xf32> -> vector<16x16xf32>
    %138 = vector.broadcast %31 : vector<16x1xf32> to vector<16x16xf32>
    %139 = arith.addf %137, %138 : vector<16x16xf32>
    %cst_90 = arith.constant dense<0.000000e+00> : vector<16xf32>
    %140 = vector.multi_reduction <add>, %139, %cst_90 [1] : vector<16x16xf32> to vector<16xf32>
    %141 = vector.shape_cast %140 : vector<16xf32> to vector<16x1xf32>
    %cst_91 = arith.constant 1.600000e+01 : f32
    %142 = vector.broadcast %cst_91 : f32 to vector<16x1xf32>
    %143 = arith.divf %141, %142 : vector<16x1xf32>
    %144 = vector.broadcast %143 : vector<16x1xf32> to vector<16x16xf32>
    %145 = arith.subf %139, %144 : vector<16x16xf32>
    %146 = arith.mulf %145, %145 : vector<16x16xf32>
    %cst_92 = arith.constant dense<0.000000e+00> : vector<16xf32>
    %147 = vector.multi_reduction <add>, %146, %cst_92 [1] : vector<16x16xf32> to vector<16xf32>
    %148 = vector.shape_cast %147 : vector<16xf32> to vector<16x1xf32>
    %cst_93 = arith.constant 0.0666666701 : f32
    %149 = vector.broadcast %cst_93 : f32 to vector<16x1xf32>
    %150 = arith.mulf %148, %149 : vector<16x1xf32>
    %cst_94 = arith.constant 9.99999974E-6 : f32
    %151 = vector.broadcast %cst_94 : f32 to vector<16x1xf32>
    %152 = arith.addf %150, %151 : vector<16x1xf32>
    %153 = math.sqrt %152 : vector<16x1xf32>
    %154 = math.rsqrt %152 : vector<16x1xf32>
    %cst_95 = arith.constant dense<0.000000e+00> : vector<32x16xf32>
    %155 = tpu.matmul %6, %43, %cst_95 {dimension_numbers = #tpu.dot_dimension_numbers<[1], [0], [0], [1], [0, 0, 1, 1], [], []>} : vector<32x16xf32>, vector<16x16xf32>, vector<32x16xf32> -> vector<32x16xf32>
    %156 = vector.broadcast %11 : vector<32x1xf32> to vector<32x16xf32>
    %157 = arith.addf %155, %156 : vector<32x16xf32>
    %158 = vector.extract_strided_slice %157 {offsets = [0, 0], sizes = [16, 16], strides = [1, 1]} : vector<32x16xf32> to vector<16x16xf32>
    %159 = vector.extract_strided_slice %157 {offsets = [16, 0], sizes = [16, 16], strides = [1, 1]} : vector<32x16xf32> to vector<16x16xf32>
    %cst_96 = arith.constant dense<0.000000e+00> : vector<16x1xf32>
    %160 = tpu.matmul %17, %52, %cst_96 {dimension_numbers = #tpu.dot_dimension_numbers<[1], [0], [0], [1], [0, 0, 1, 1], [], []>} : vector<16x16xf32>, vector<16x1xf32>, vector<16x1xf32> -> vector<16x1xf32>
    %cst_97 = arith.constant dense<0.000000e+00> : vector<16x1xf32>
    %161 = tpu.matmul %23, %143, %cst_97 {dimension_numbers = #tpu.dot_dimension_numbers<[1], [0], [0], [1], [0, 0, 1, 1], [], []>} : vector<16x16xf32>, vector<16x1xf32>, vector<16x1xf32> -> vector<16x1xf32>
    %162 = arith.addf %160, %161 : vector<16x1xf32>
    %163 = arith.addf %162, %28 : vector<16x1xf32>
    %164 = vector.broadcast %163 : vector<16x1xf32> to vector<16x16xf32>
    %165 = arith.mulf %158, %164 : vector<16x16xf32>
    %cst_98 = arith.constant 1.000000e+00 : f32
    %166 = vector.broadcast %cst_98 : f32 to vector<16x1xf32>
    %167 = arith.subf %166, %163 : vector<16x1xf32>
    %168 = arith.mulf %153, %167 : vector<16x1xf32>
    %169 = vector.broadcast %168 : vector<16x1xf32> to vector<16x16xf32>
    %170 = arith.addf %165, %169 : vector<16x16xf32>
    %171 = vector.broadcast %163 : vector<16x1xf32> to vector<16x16xf32>
    %172 = arith.mulf %159, %171 : vector<16x16xf32>
    %cst_99 = arith.constant 1.000000e+00 : f32
    %173 = vector.broadcast %cst_99 : f32 to vector<16x1xf32>
    %174 = arith.subf %173, %163 : vector<16x1xf32>
    %175 = arith.mulf %143, %174 : vector<16x1xf32>
    %176 = vector.broadcast %175 : vector<16x1xf32> to vector<16x16xf32>
    %177 = arith.addf %172, %176 : vector<16x16xf32>
    %cst_100 = arith.constant 1.000000e+00 : f32
    %178 = vector.broadcast %cst_100 : f32 to vector<16x16xf32>
    %179 = arith.addf %178, %170 : vector<16x16xf32>
    %180 = vector.broadcast %154 : vector<16x1xf32> to vector<16x16xf32>
    %181 = arith.mulf %179, %180 : vector<16x16xf32>
    %182 = arith.mulf %145, %181 : vector<16x16xf32>
    %183 = arith.addf %182, %177 : vector<16x16xf32>
    %cst_101 = arith.constant 0.000000e+00 : f32
    %184 = vector.broadcast %cst_101 : f32 to vector<16x16xf32>
    %185 = arith.cmpf oge, %183, %184 : vector<16x16xf32>
    %cst_102 = arith.constant 2.000000e-01 : f32
    %186 = vector.broadcast %cst_102 : f32 to vector<16x16xf32>
    %187 = arith.mulf %186, %183 : vector<16x16xf32>
    %188 = arith.select %185, %183, %187 : vector<16x16xi1>, vector<16x16xf32>
    %cst_103 = arith.constant dense<0.000000e+00> : vector<16x16xf32>
    %189 = tpu.matmul %32, %188, %cst_103 {dimension_numbers = #tpu.dot_dimension_numbers<[1], [0], [0], [1], [0, 0, 1, 1], [], []>} : vector<16x16xf32>, vector<16x16xf32>, vector<16x16xf32> -> vector<16x16xf32>
    %190 = vector.broadcast %33 : vector<16x1xf32> to vector<16x16xf32>
    %191 = arith.addf %189, %190 : vector<16x16xf32>
    %192 = arith.addf %102, %191 : vector<16x16xf32>
    %c0_104 = arith.constant 0 : index
    %c0_105 = arith.constant 0 : index
    %c0_106 = arith.constant 0 : index
    %193 = vector.load %arg18[%c0_104, %c0_105, %c0_106] : memref<1x16x16xf32, #tpu.memory_space<vmem>>, vector<1x16x16xf32>
    %194 = vector.shape_cast %193 : vector<1x16x16xf32> to vector<16x16xf32>
    %195 = vector.shape_cast %192 : vector<16x16xf32> to vector<1x16x16xf32>
    tpu.vector_store %arg18[%c0_104, %c0_105, %c0_106], %195 {strides = array<i32>} : memref<1x16x16xf32, #tpu.memory_space<vmem>>, vector<1x16x16xf32>,
    return
  }
  func.func @transform_0(%arg0: i32) -> (i32, i32, i32) {
    %c0_i32 = arith.constant 0 : i32
    %c0_i32_0 = arith.constant 0 : i32
    %c0_i32_1 = arith.constant 0 : i32
    return %arg0, %c0_i32, %c0_i32_0 : i32, i32, i32
  }
  func.func @transform_1(%arg0: i32) -> (i32, i32, i32) {
    %c0_i32 = arith.constant 0 : i32
    %c0_i32_0 = arith.constant 0 : i32
    %c0_i32_1 = arith.constant 0 : i32
    return %arg0, %c0_i32, %c0_i32_0 : i32, i32, i32
  }
  func.func @transform_2(%arg0: i32) -> (i32, i32) {
    %c0_i32 = arith.constant 0 : i32
    %c0_i32_0 = arith.constant 0 : i32
    %c0_i32_1 = arith.constant 0 : i32
    return %c0_i32, %c0_i32_0 : i32, i32
  }
  func.func @transform_3(%arg0: i32) -> (i32, i32) {
    %c0_i32 = arith.constant 0 : i32
    %c0_i32_0 = arith.constant 0 : i32
    %c0_i32_1 = arith.constant 0 : i32
    return %c0_i32, %c0_i32_0 : i32, i32
  }
  func.func @transform_4(%arg0: i32) -> (i32, i32, i32) {
    %c0_i32 = arith.constant 0 : i32
    %c0_i32_0 = arith.constant 0 : i32
    %c0_i32_1 = arith.constant 0 : i32
    %c0_i32_2 = arith.constant 0 : i32
    return %c0_i32, %c0_i32_0, %c0_i32_1 : i32, i32, i32
  }
  func.func @transform_5(%arg0: i32) -> (i32, i32, i32) {
    %c0_i32 = arith.constant 0 : i32
    %c0_i32_0 = arith.constant 0 : i32
    %c0_i32_1 = arith.constant 0 : i32
    %c0_i32_2 = arith.constant 0 : i32
    return %c0_i32, %c0_i32_0, %c0_i32_1 : i32, i32, i32
  }
  func.func @transform_6(%arg0: i32) -> (i32, i32) {
    %c0_i32 = arith.constant 0 : i32
    %c0_i32_0 = arith.constant 0 : i32
    %c0_i32_1 = arith.constant 0 : i32
    return %c0_i32, %c0_i32_0 : i32, i32
  }
  func.func @transform_7(%arg0: i32) -> (i32, i32) {
    %c0_i32 = arith.constant 0 : i32
    %c0_i32_0 = arith.constant 0 : i32
    %c0_i32_1 = arith.constant 0 : i32
    return %c0_i32, %c0_i32_0 : i32, i32
  }
  func.func @transform_8(%arg0: i32) -> (i32, i32, i32, i32) {
    %c0_i32 = arith.constant 0 : i32
    %c0_i32_0 = arith.constant 0 : i32
    %c0_i32_1 = arith.constant 0 : i32
    %c0_i32_2 = arith.constant 0 : i32
    %c0_i32_3 = arith.constant 0 : i32
    return %c0_i32, %c0_i32_0, %c0_i32_1, %c0_i32_2 : i32, i32, i32, i32
  }
  func.func @transform_9(%arg0: i32) -> (i32, i32, i32) {
    %c0_i32 = arith.constant 0 : i32
    %c0_i32_0 = arith.constant 0 : i32
    %c0_i32_1 = arith.constant 0 : i32
    %c0_i32_2 = arith.constant 0 : i32
    return %c0_i32, %c0_i32_0, %c0_i32_1 : i32, i32, i32
  }
  func.func @transform_10(%arg0: i32) -> (i32, i32, i32) {
    %c0_i32 = arith.constant 0 : i32
    %c0_i32_0 = arith.constant 0 : i32
    %c0_i32_1 = arith.constant 0 : i32
    %c0_i32_2 = arith.constant 0 : i32
    return %c0_i32, %c0_i32_0, %c0_i32_1 : i32, i32, i32
  }
  func.func @transform_11(%arg0: i32) -> (i32, i32) {
    %c0_i32 = arith.constant 0 : i32
    %c0_i32_0 = arith.constant 0 : i32
    %c0_i32_1 = arith.constant 0 : i32
    return %c0_i32, %c0_i32_0 : i32, i32
  }
  func.func @transform_12(%arg0: i32) -> (i32, i32) {
    %c0_i32 = arith.constant 0 : i32
    %c0_i32_0 = arith.constant 0 : i32
    %c0_i32_1 = arith.constant 0 : i32
    return %c0_i32, %c0_i32_0 : i32, i32
  }
  func.func @transform_13(%arg0: i32) -> (i32, i32) {
    %c0_i32 = arith.constant 0 : i32
    %c0_i32_0 = arith.constant 0 : i32
    %c0_i32_1 = arith.constant 0 : i32
    return %c0_i32, %c0_i32_0 : i32, i32
  }
  func.func @transform_14(%arg0: i32) -> (i32, i32) {
    %c0_i32 = arith.constant 0 : i32
    %c0_i32_0 = arith.constant 0 : i32
    %c0_i32_1 = arith.constant 0 : i32
    return %c0_i32, %c0_i32_0 : i32, i32
  }
  func.func @transform_15(%arg0: i32) -> (i32, i32) {
    %c0_i32 = arith.constant 0 : i32
    %c0_i32_0 = arith.constant 0 : i32
    %c0_i32_1 = arith.constant 0 : i32
    return %c0_i32, %c0_i32_0 : i32, i32
  }
  func.func @transform_16(%arg0: i32) -> (i32, i32) {
    %c0_i32 = arith.constant 0 : i32
    %c0_i32_0 = arith.constant 0 : i32
    %c0_i32_1 = arith.constant 0 : i32
    return %c0_i32, %c0_i32_0 : i32, i32
  }
  func.func @transform_17(%arg0: i32) -> (i32, i32, i32) {
    %c0_i32 = arith.constant 0 : i32
    %c0_i32_0 = arith.constant 0 : i32
    %c0_i32_1 = arith.constant 0 : i32
    return %arg0, %c0_i32, %c0_i32_0 : i32, i32, i32
  }
}

</mosaic_0001>

<bundles_post_ra>
// kernel: tpu_custom_call.1
= control target key start
LH: loop header
LB: loop body
LE: loop exit
PB: predicated region body
PF: predicated region fallthrough
CT: control target
= control target key end

     0   :  { %s4162_s0 = inlined_call_operand.vmem [shape: f32[2,32,16], index: 0, kind: input, shape index: {}]   ;;  %s4163_s1 = inlined_call_operand.vmem [shape: f32[2,8,16], index: 1, kind: input, shape index: {}]   ;;  %s4164_s2 = inlined_call_operand.vmem [shape: f32[80,8], index: 2, kind: input, shape index: {}]   ;;  %s4165_s3 = inlined_call_operand.vmem [shape: f32[80,1], index: 3, kind: input, shape index: {}]   ;;  %s4166_s4 = inlined_call_operand.vmem [shape: f32[2,64,32], index: 4, kind: input, shape index: {}]   ;;  %s4167_s5 = inlined_call_operand.vmem [shape: f32[2,64,1], index: 5, kind: input, shape index: {}]   ;;  %s4168_s6 = inlined_call_operand.vmem [shape: f32[32,16], index: 6, kind: input, shape index: {}]   ;;  %s4169_s7 = inlined_call_operand.vmem [shape: f32[32,1], index: 7, kind: input, shape index: {}]   ;;  %s4170_s8 = inlined_call_operand.vmem [shape: f32[2,2,32,32], index: 8, kind: input, shape index: {}]   ;;  %s4171_s9 = inlined_call_operand.vmem [shape: f32[2,32,1], index: 9, kind: input, shape index: {}]   ;;  %s4172_s10 = inlined_call_operand.vmem [shape: f32[2,16,16], index: 10, kind: input, shape index: {}]   ;;  %s4173_s11 = inlined_call_operand.vmem [shape: f32[16,1], index: 11, kind: input, shape index: {}]   ;;  %s4174_s12 = inlined_call_operand.vmem [shape: f32[16,32], index: 12, kind: input, shape index: {}]   ;;  %s4175_s13 = inlined_call_operand.vmem [shape: f32[16,32], index: 13, kind: input, shape index: {}]   ;;  %s4176_s14 = inlined_call_operand.vmem [shape: f32[16,1], index: 14, kind: input, shape index: {}]   ;;  %s4177_s15 = inlined_call_operand.vmem [shape: f32[16,16], index: 15, kind: input, shape index: {}]   ;;  %s4178_s16 = inlined_call_operand.vmem [shape: f32[16,1], index: 16, kind: input, shape index: {}]   ;;  %s4179_s17 = inlined_call_operand.hbm [shape: f32[2,16,16], index: 17, kind: output, shape index: {}]  }
   0x1   :  { %4196 = sst [smem:[#allocation16_spill]] %s4162_s0 }
   0x2   :  { %4197 = sst [smem:[#allocation17_spill]] %s4163_s1 }
   0x3   :  { %4198 = sst [smem:[#allocation18_spill]] %s4179_s17 }
   0x4   :  { %22 = vsyncpa [#allocation3], 0 }
   0x5   :  { %24 = vsyncpa [#allocation3 + $0x1], 0  ;;  %s3386_s24 = smov 0   ;;  %s3388_s25 = smov 0  }
   0x6   :  { %s3390_s26 = smov 0   ;;  %s3392_s27 = smov 0  }
   0x7 LB: > { %4199 = sst [smem:[#allocation5_spill]] %s3278_s24  ;;  %s3407_s28 = sadd.s32 4294967295, %s3290_s27   ;;  %s3290_s27 = sphi %s3392_s27, %s4227_s27   ;;  %s3286_s26 = sphi %s3390_s26, %s4229_s26   ;;  %s3282_s25 = sphi %s3388_s25, %s4231_s25   ;;  %s3278_s24 = sphi %s3386_s24, %s4230_s24  }
   0x8   : > { %4200 = sst [smem:[#allocation6_spill]] %s3286_s26  ;;  %s2766_s29 = sadd.s32 4294967294, %s3290_s27  }
   0x9   : > { %4201 = sst [smem:[#allocation7_spill]] %s3290_s27  ;;  %s3411_s0 = sadd.s32 1, %s3290_s27  }
   0xa   : > { %4202 = sst [smem:[#allocation8_spill]] %s3407_s28  ;;  %s404_s30 = sadd.s32 1, %s3286_s26 }
   0xb   : > { %4203 = sst [smem:[#allocation9_spill]] %s3411_s0  ;;  %s401_s18 = ssub.s32 %s3290_s27, %s3411_s0 }
   0xc   : > { %p414_p0 = scmp.ne.s32.totalorder %s3286_s26, %s3282_s25  ;;  %p402_p1 = scmp.eq.s32.totalorder %s401_s18, 0 }
   0xd   : > { %p415_p2 = scmp.eq.s32.totalorder %s3407_s28, 1  ;;  %p420_p3 = scmp.ne.s32.totalorder %s3282_s25, %s3278_s24 }
   0xe   : > { %p421_p4 = scmp.eq.s32.totalorder %s2766_s29, 1  ;;  %p2769_p7 = scmp.ge.s32.totalorder %s3290_s27, 1 }
   0xf   : > { %s3422_s19 = scalar_select %p402_p1, %s3286_s26, %s404_s30  }
  0x10   : > { %p3424_p5 = por %p415_p2, %p414_p0  ;;  %p3428_p6 = por %p421_p4, %p420_p3 }
  0x11   : > { %4204 = sst [smem:[#allocation10_spill]] %s3422_s19  ;;  %p499_p8 = scmp.lt.s32.totalorder %s3290_s27, 3 }
  0x12   : > { %s4205_s1 = scalar_select %p3424_p5, 1, 0 }
  0x13   : > { %s4207_s20 = scalar_select %p3428_p6, 1, 0 }
  0x14   : > { %4206 = sst [smem:[#allocation11_spill]] %s4205_s1  ;;  %p500_p9 = pnand %p2769_p7, %p499_p8 }
  0x15   : > { %4208 = sst [smem:[#allocation12_spill]] %s4207_s20 }
  0x16   : > { %503 = sbr.rel (%p500_p9) target bundleno = 1656 (0x678), region = 88 }
  0x1b   : > { %p555_p10 = scmp.lt.s32.totalorder %s3407_s28, 1  ;;  %v564_v0 = vld [vmem:[%s4164_s2] sm:$0xff]  ;;  %vm726_vm0 = vcmask 64512   ;;  %v3292_v1 = vmov 0   ;;  %vm872_vm1 = vcmask 130048   ;;  %s4209_s26 = sld [smem:[#allocation17_spill]] }
  0x1c   : > { %2991 = vmatprep.mubr.msk.f32.mxu0 %vm726_vm0, %v564_v0  ;;  %3216 = vset.pattern.permute.xlu1 %v3292_v1  ;;  %v3446_v2 = vld [vmem:[%s4164_s2 + $0x8] sm:$0xff]  ;;  %s4210_s27 = sld [smem:[#allocation16_spill]]  ;;  %v3454_v3 = vld [vmem:[%s4164_s2 + $0x40] sm:$0xff]  ;;  %v566_v8 = vld [vmem:[%s4164_s2 + $0x10] sm:$0xff]  ;;  %vm1109_vm2 = vcmask 261120   ;;  %s552_s24 = sand.u32 1, %s3282_s25  }
  0x1d   : > { %s556_s23 = scalar_select %p555_p10, %s3407_s28, 1  ;;  %3217 = vset.pattern.permute.xlu0 %v3292_v1  ;;  %3003 = vmatprep.mubr.msk.f32.mxu1 %vm726_vm0, %v3454_v3  ;;  %v3470_v11 = vld [vmem:[%s4164_s2 + $0x48] sm:$0xff]  ;;  %v567_v13 = vld [vmem:[%s4164_s2 + $0x18] sm:$0xff]  ;;  %v568_v16 = vld [vmem:[%s4164_s2 + $0x20] sm:$0xff] }
  0x1e   : > { %v569_v18 = vld [vmem:[%s4164_s2 + $0x28] sm:$0xff]  ;;  %v570_v19 = vld [vmem:[%s4164_s2 + $0x30] sm:$0xff]  ;;  %v571_v20 = vld [vmem:[%s4164_s2 + $0x38] sm:$0xff]  ;;  %s4221_s18 = sld [smem:[#allocation8_spill]] }
  0x1f   : > { %s2773_s29 = sshll.u32 %s556_s23, 3  ;;  %s2879_s30 = sshll.u32 %s556_s23, 5  ;;  %v3509_v21 = vld [vmem:[%s4165_s3 + $0x18] sm:$0xff]  ;;  %v3515_v22 = vld [vmem:[%s4165_s3 + $0x8] sm:$0xff]  ;;  %v3521_v23 = vld [vmem:[%s4165_s3 + $0x10] sm:$0xff] }
  0x20   : > { %v3526_v24 = vld [vmem:[%s4165_s3] sm:$0xff]  ;;  %v3533_v25 = vld [vmem:[%s4165_s3 + $0x38] sm:$0xff]  ;;  %v3539_v26 = vld [vmem:[%s4165_s3 + $0x30] sm:$0xff] }
  0x21   : > { %s563_s0 = scalar_lea.vmem %s4209_s26, %s2773_s29  ;;  %v3545_v27 = vld [vmem:[%s4165_s3 + $0x28] sm:$0xff]  ;;  %v3551_v28 = vld [vmem:[%s4165_s3 + $0x20] sm:$0xff]  ;;  %v2785_v52 = vld [vmem:[%s4167_s5 + $0x58] sm:$0xff]  ;;  %s2770_s26 = sshll.u32 %s552_s24, 4 }
  0x22   : > { %s559_s17 = scalar_lea.vmem %s4210_s27, %s2879_s30  ;;  %v675_v4 = vld [vmem:[%s563_s0] sm:$0xff]  ;;  %s554_s27 = scalar_lea.vmem [#allocation2], %s2770_s26 }
  0x23   : > { %v3456_v5 = vld [vmem:[%s559_s17 + $0x18] sm:$0xff]  ;;  %v673_v6 = vld [vmem:[%s559_s17 + $0x10] sm:$0xff]  ;;  %v873_v7 = vsel %vm872_vm1, %v675_v4, 0.0  ;;  %2989 = vmatprep.subr.mxu0 %v675_v4  ;;  %v3465_v10 = vld [vmem:[%s559_s17 + $0x8] sm:$0xff]  ;;  %3172 = vmatprep.subr.mxu1 %v675_v4  ;;  %s2692_s0 = sshll.u32 %s554_s27, 4  ;;  %s4122_s29 = scalar_lea.sflag [#allocation3], %s552_s24  ;;  %s4113_s0 = int_to_ptr.vmem [resolvable:$true] %s2692_s0 }
  0x24   : > { %v999_v9 = vsel %vm872_vm1, %v673_v6, 0.0  ;;  %874 = vadd.xlane.f32.xlu0 %v873_v7  ;;  %2990 = vmatpush3.msra.mxu0 %v675_v4  ;;  %v1002_v12 = vsel %vm872_vm1, %v3456_v5, 0.0  ;;  %v996_v14 = vsel %vm872_vm1, %v3465_v10, 0.0  ;;  %v3482_v15 = vld [vmem:[%s559_s17] sm:$0xff]  ;;  %s2880_s19 = sshll.u32 %s4221_s18, 8  ;;  %s4223_s17 = sld [smem:[#allocation18_spill]] }
  0x25   : > { %2992 = vmatmul.mubr.msk.f32.vlgmr.msra.gmra.mxu0 %vm726_vm0, %v3446_v2  ;;  %1000 = vadd.xlane.f32.xlu1 %v999_v9  ;;  %v993_v17 = vsel %vm872_vm1, %v3482_v15, 0.0  ;;  %v584_v29 = vld [vmem:[%s4166_s4] sm:$0xff]  ;;  %s3230_s30 = scalar_lea.vmem %s4113_s0, 256  ;;  %s3293_s18 = smov [#allocation2]  }
  0x26   : > { %2994 = vmatprep.mubr.msk.f32.mxu0 %vm726_vm0, %v566_v8  ;;  %3173 = vmatpush3.msra.mxu1 %v675_v4  ;;  %p3231_p11 = scmp.ne.s32.totalorder %s4113_s0, %s3230_s30  ;;  %s3234_s21 = sshll.u32 %s3293_s18, 4  ;;  %s3235_s21 = int_to_ptr.vmem [resolvable:$false] %s3234_s21 }
  0x27   : > { %3004 = vmatmul.mubr.msk.f32.vlgmr.msra.gmra.mxu1 %vm726_vm0, %v3470_v11  ;;  %s3236_s22 = scalar_lea.vmem %s3235_s21, 512  ;;  %p3237_p0 = scmp.lt.s32.totalorder %s4113_s0, %s3235_s21 }
  0x28   : > { %1003 = vadd.xlane.f32.xlu0 %v1002_v12  ;;  %3008 = vmatprep.mubr.msk.f32.mxu1 %vm726_vm0, %v564_v0  ;;  %v2783_v12 = vld [vmem:[%s4167_s5 + $0x48] sm:$0xff]  ;;  %p3232_p12 = pnand %p3231_p11, %p3424_p5  ;;  %p3238_p1 = scmp.lt.s32.totalorder %s3236_s22, %s3230_s30 }
  0x29   : > { %2995 = vmatmul.mubr.msk.f32.gmra.mxu0 %vm726_vm0, %v567_v13  ;;  %997 = vadd.xlane.f32.xlu1 %v996_v14 }
  0x2a   : > { %2997 = vmatprep.mubr.msk.f32.mxu0 %vm726_vm0, %v568_v16  ;;  %s4118_s23 = scalar_lea.hbm %s4223_s17, %s2880_s19  ;;  %p3233_p13 = pneg %p3232_p12 }
  0x2b   : > { %p3239_p2 = por %p3238_p1, %p3237_p0 }
  0x2c   : > { %994 = vadd.xlane.f32.xlu0 %v993_v17  ;;  %v588_v17 = vld [vmem:[%s4166_s4 + $0x20] sm:$0xff] }
  0x2d   : > { %2998 = vmatmul.mubr.msk.f32.gmra.mxu0 %vm726_vm0, %v569_v18  ;;  %p3240_p3 = pnand %p3239_p2, %p3233_p13 }
  0x2e   : > { %3000 = vmatprep.mubr.msk.f32.mxu0 %vm726_vm0, %v570_v19 }
  0x31   : > { %3001 = vmatmul.mubr.msk.f32.gmra.mxu0 %vm726_vm0, %v571_v20 }
  0x32   : > { %3031 = vmatprep.mubr.msk.f32.mxu0 %vm1109_vm2, %v584_v29  ;;  %v589_v29 = vld [vmem:[%s4166_s4 + $0x28] sm:$0xff] }
  0x3a   : > { %693 = vperm.xlu1 %3216, %v3509_v21  }
  0x3e   : > { %683 = vperm.xlu1 %3216, %v3515_v22  }
  0x42   : > { %688 = vperm.xlu0 %3217, %v3521_v23   ;;  %678 = vperm.xlu1 %3216, %v3526_v24  }
  0x46   : > { %713 = vperm.xlu1 %3216, %v3533_v25  }
  0x4a   : > { %708 = vperm.xlu1 %3216, %v3539_v26  }
  0x4e   : > { %703 = vperm.xlu1 %3216, %v3545_v27  }
  0x52   : > { %698 = vperm.xlu1 %3216, %v3551_v28  }
  0xad   : > { %v875_v30 = vpop.xlane.xlu0 %874 }
  0xae   : > { %v877_v31 = vmul.f32 0.0625, %v875_v30  ;;  %v1001_v32 = vpop.xlane.xlu1 %1000  ;;  %v2784_v30 = vld [vmem:[%s4167_s5 + $0x50] sm:$0xff] }
  0xaf   : > { %v3558_v33 = vmul.f32 0.0625, %v1001_v32  ;;  %v2796_v32 = vld [vmem:[%s4170_s8 + $0x30] sm:$0xff] }
  0xb0   : > { %3006 = vmatprep.subr.mxu1 %v877_v31 }
  0xb1   : > { %3007 = vmatpush3.msra.mxu1 %v877_v31  ;;  %v1004_v34 = vpop.xlane.xlu0 %1003  ;;  %v3561_v35 = vsub.f32 %v673_v6, %v3558_v33  ;;  %v585_v6 = vld [vmem:[%s4166_s4 + $0x8] sm:$0xff]  ;;  %v590_v31 = vld [vmem:[%s4166_s4 + $0x30] sm:$0xff] }
  0xb2   : > { %3009 = vmatmul.mubr.msk.f32.vlgmr.msra.gmra.mxu1 %vm726_vm0, %v3446_v2  ;;  %v3565_v36 = vmul.f32 0.0625, %v1004_v34  ;;  %v998_v37 = vpop.xlane.xlu1 %997  ;;  %v2787_v34 = vld [vmem:[%s4167_s5 + $0x68] sm:$0xff] }
  0xb3   : > { %3011 = vmatprep.mubr.msk.f32.mxu1 %vm726_vm0, %v566_v8  ;;  %v3568_v38 = vmul.f32 0.0625, %v998_v37  ;;  %v1015_v39 = vmul.f32 %v3561_v35, %v3561_v35  ;;  %v586_v8 = vld [vmem:[%s4166_s4 + $0x10] sm:$0xff]  ;;  %v2797_v37 = vld [vmem:[%s4170_s8 + $0x38] sm:$0xff] }
  0xb4   : > { %v3574_v40 = vsub.f32 %v3456_v5, %v3565_v36  ;;  %3043 = vmatprep.subr.mxu1 %v3565_v36 }
  0xb5   : > { %4211 = vst [vmem:[#allocation13_spill] sm:$0xff] %v3568_v38  ;;  %v995_v41 = vpop.xlane.xlu0 %994  ;;  %v3579_v42 = vsub.f32 %v3465_v10, %v3568_v38  ;;  %v1023_v43 = vsel %vm872_vm1, %v1015_v39, 0.0  ;;  %3044 = vmatpush3.msra.mxu1 %v3565_v36  ;;  %v591_v39 = vld [vmem:[%s4166_s4 + $0x38] sm:$0xff] }
  0xb6   : > { %3012 = vmatmul.mubr.msk.f32.gmra.mxu1 %vm726_vm0, %v567_v13  ;;  %v3584_v44 = vmul.f32 0.0625, %v995_v41  ;;  %v1016_v45 = vmul.f32 %v3574_v40, %v3574_v40  ;;  %1024 = vadd.xlane.f32.xlu0 %v1023_v43  ;;  %v694_v53 = vpop.permute.xlu1 %693  ;;  %v2782_v41 = vld [vmem:[%s4167_s5 + $0x40] sm:$0xff] }
  0xb7   : > { %3014 = vmatprep.mubr.msk.f32.mxu1 %vm726_vm0, %v568_v16  ;;  %v1014_v46 = vmul.f32 %v3579_v42, %v3579_v42  ;;  %3045 = vmatprep.subr.mxu1 %v3558_v33  ;;  %v2794_v16 = vld [vmem:[%s4170_s8 + $0x20] sm:$0xff] }
  0xb8   : > { %4212 = vst [vmem:[#allocation14_spill] sm:$0xff] %v3584_v44  ;;  %v1026_v47 = vsel %vm872_vm1, %v1016_v45, 0.0  ;;  %v3595_v48 = vsub.f32 %v3482_v15, %v3584_v44  ;;  %3046 = vmatpush3.msra.mxu1 %v3558_v33  ;;  %v587_v15 = vld [vmem:[%s4166_s4 + $0x18] sm:$0xff]  ;;  %v2774_v43 = vld [vmem:[%s4166_s4 + $0x40] sm:$0xff] }
  0xb9   : > { %1027 = vadd.xlane.f32.xlu1 %v1026_v47  ;;  %3047 = vmatprep.subr.mxu1 %v3568_v38  ;;  %v1020_v49 = vsel %vm872_vm1, %v1014_v46, 0.0  ;;  %v626_v45 = vld [vmem:[%s4170_s8] sm:$0xff]  ;;  %v2775_v46 = vld [vmem:[%s4166_s4 + $0x48] sm:$0xff]  ;;  %v2788_v47 = vld [vmem:[%s4167_s5 + $0x70] sm:$0xff] }
  0xba   : > { %3015 = vmatmul.mubr.msk.f32.gmra.mxu1 %vm726_vm0, %v569_v18  ;;  %v1013_v50 = vmul.f32 %v3595_v48, %v3595_v48  ;;  %v684_v54 = vpop.permute.xlu1 %683 }
  0xbb   : > { %3017 = vmatprep.mubr.msk.f32.mxu1 %vm726_vm0, %v570_v19  ;;  %3048 = vmatpush3.msra.mxu1 %v3568_v38  ;;  %v2789_v19 = vld [vmem:[%s4167_s5 + $0x78] sm:$0xff] }
  0xbc   : > { %v1017_v51 = vsel %vm872_vm1, %v1013_v50, 0.0  ;;  %3049 = vmatprep.subr.mxu1 %v3584_v44  ;;  %v2777_v50 = vld [vmem:[%s4166_s4 + $0x58] sm:$0xff] }
  0xbd   : > { %1021 = vadd.xlane.f32.xlu1 %v1020_v49  ;;  %1018 = vadd.xlane.f32.xlu0 %v1017_v51  ;;  %v689_v61 = vpop.permute.xlu0 %688  ;;  %v2776_v49 = vld [vmem:[%s4166_s4 + $0x50] sm:$0xff]  ;;  %v2778_v51 = vld [vmem:[%s4166_s4 + $0x60] sm:$0xff] }
  0xbe   : > { %3018 = vmatmul.mubr.msk.f32.gmra.mxu1 %vm726_vm0, %v571_v20  ;;  %v679_v55 = vpop.permute.xlu1 %678  ;;  %v2795_v20 = vld [vmem:[%s4170_s8 + $0x28] sm:$0xff] }
  0xbf   : > { %3020 = vmatprep.mubr.msk.f32.mxu1 %vm726_vm0, %v3454_v3  ;;  %3050 = vmatpush3.msra.mxu1 %v3584_v44 }
  0xc2   : > { %3021 = vmatmul.mubr.msk.f32.gmra.mxu1 %vm726_vm0, %v3470_v11  ;;  %v714_v56 = vpop.permute.xlu1 %713 }
  0xc3   : > { %3051 = vmatprep.mubr.msk.f32.mxu1 %vm1109_vm2, %v2794_v16 }
  0xc6   : > { %v709_v59 = vpop.permute.xlu1 %708  ;;  %3052 = vmatmul.mubr.msk.f32.vlgmr.msra.gmra.mxu1 %vm1109_vm2, %v2795_v20 }
  0xc7   : > { %3054 = vmatprep.mubr.msk.f32.mxu1 %vm1109_vm2, %v2796_v32 }
  0xca   : > { %v704_v3 = vpop.permute.xlu1 %703  ;;  %3055 = vmatmul.mubr.msk.f32.gmra.mxu1 %vm1109_vm2, %v2797_v37 }
  0xcb   : > { %3065 = vmatprep.mubr.msk.f32.mxu1 %vm1109_vm2, %v626_v45 }
  0xce   : > { %1570 = vperm.xlu1 %3216, %v2785_v52   ;;  %v699_v11 = vpop.permute.xlu1 %698  ;;  %v2779_v52 = vld [vmem:[%s4166_s4 + $0x68] sm:$0xff] }
  0xd2   : > { %1560 = vperm.xlu1 %3216, %v2783_v12  }
  0xd3   : > { %1565 = vperm.xlu0 %3217, %v2784_v30  }
  0xd6   : > { %1590 = vperm.xlu1 %3216, %v2789_v19  }
  0xd7   : > { %1555 = vperm.xlu0 %3217, %v2782_v41  }
  0xda   : > { %1580 = vperm.xlu1 %3216, %v2787_v34  }
  0xdb   : > { %1585 = vperm.xlu0 %3217, %v2788_v47  }
  0xe5   : > { %v2993_v57 = vpop.f32.mrf.mxu0 }
  0xe6   : > { %v829_v0 = vadd.f32 %v2993_v57, %v684_v54  ;;  %v2781_v54 = vld [vmem:[%s4166_s4 + $0x78] sm:$0xff] }
  0xe7   : > { %v823_v58 = vpop.f32.mrf.mxu0 }
  0xe8   : > { %v824_v4 = vadd.f32 %v823_v58, %v679_v55  ;;  %v3714_v55 = vpop.f32.mrf.mxu1 }
  0xe9   : > { %v2996_v60 = vpop.f32.mrf.mxu0 }
  0xea   : > { %v839_v62 = vadd.f32 %v2996_v60, %v694_v53  ;;  %v2780_v53 = vld [vmem:[%s4166_s4 + $0x70] sm:$0xff] }
  0xeb   : > { %v833_v63 = vpop.f32.mrf.mxu0 }
  0xec   : > { %v834_v1 = vadd.f32 %v833_v63, %v689_v61  ;;  %3023 = vmatprep.subr.mxu0 %v839_v62 }
  0xed   : > { %3024 = vmatpush3.msra.mxu0 %v839_v62  ;;  %v2999_v2 = vpop.f32.mrf.mxu0 }
  0xee   : > { %3025 = vmatprep.subr.mxu0 %v834_v1  ;;  %v849_v14 = vadd.f32 %v2999_v2, %v704_v3  ;;  %v627_v2 = vld [vmem:[%s4170_s8 + $0x8] sm:$0xff] }
  0xef   : > { %3026 = vmatpush3.msra.mxu0 %v834_v1  ;;  %v843_v5 = vpop.f32.mrf.mxu0 }
  0xf0   : > { %3027 = vmatprep.subr.mxu0 %v829_v0  ;;  %v844_v18 = vadd.f32 %v843_v5, %v699_v11  ;;  %v2791_v11 = vld [vmem:[%s4170_s8 + $0x48] sm:$0xff] }
  0xf1   : > { %3028 = vmatpush3.msra.mxu0 %v829_v0  ;;  %v3002_v7 = vpop.f32.mrf.mxu0 }
  0xf2   : > { %3029 = vmatprep.subr.mxu0 %v824_v4  ;;  %v859_v9 = vadd.f32 %v3002_v7, %v714_v56  ;;  %v3716_v56 = vpop.f32.mrf.mxu1  ;;  %v2800_v7 = vld [vmem:[%s4170_s8 + $0x70] sm:$0xff] }
  0xf3   : > { %3030 = vmatpush3.msra.mxu0 %v824_v4  ;;  %v853_v10 = vpop.f32.mrf.mxu0 }
  0xf4   : > { %3032 = vmatmul.mubr.msk.f32.vlgmr.msra.gmra.mxu0 %vm1109_vm2, %v585_v6  ;;  %v854_v13 = vadd.f32 %v853_v10, %v709_v59  ;;  %3071 = vmatprep.subr.mxu0 %v859_v9  ;;  %v2799_v6 = vld [vmem:[%s4170_s8 + $0x68] sm:$0xff]  ;;  %v2790_v10 = vld [vmem:[%s4170_s8 + $0x40] sm:$0xff] }
  0xf5   : > { %3034 = vmatprep.mubr.msk.f32.mxu0 %vm1109_vm2, %v586_v8  ;;  %3072 = vmatpush3.msra.mxu0 %v859_v9  ;;  %v2801_v8 = vld [vmem:[%s4170_s8 + $0x78] sm:$0xff] }
  0xf6   : > { %3073 = vmatprep.subr.mxu0 %v854_v13 }
  0xf7   : > { %3074 = vmatpush3.msra.mxu0 %v854_v13 }
  0xf8   : > { %3035 = vmatmul.mubr.msk.f32.gmra.mxu0 %vm1109_vm2, %v587_v15  ;;  %3075 = vmatprep.subr.mxu0 %v849_v14 }
  0xf9   : > { %3037 = vmatprep.mubr.msk.f32.mxu0 %vm1109_vm2, %v588_v17  ;;  %3076 = vmatpush3.msra.mxu0 %v849_v14 }
  0xfa   : > { %3077 = vmatprep.subr.mxu0 %v844_v18 }
  0xfb   : > { %3078 = vmatpush3.msra.mxu0 %v844_v18 }
  0xfc   : > { %3038 = vmatmul.mubr.msk.f32.gmra.mxu0 %vm1109_vm2, %v589_v29 }
  0xfd   : > { %3040 = vmatprep.mubr.msk.f32.mxu0 %vm1109_vm2, %v590_v31 }
 0x100   : > { %3041 = vmatmul.mubr.msk.f32.gmra.mxu0 %vm1109_vm2, %v591_v39 }
 0x101   : > { %3079 = vmatprep.mubr.msk.f32.mxu0 %vm1109_vm2, %v2774_v43 }
 0x104   : > { %3080 = vmatmul.mubr.msk.f32.vlgmr.msra.gmra.mxu0 %vm1109_vm2, %v2775_v46 }
 0x105   : > { %3082 = vmatprep.mubr.msk.f32.mxu0 %vm1109_vm2, %v2776_v49 }
 0x108   : > { %3083 = vmatmul.mubr.msk.f32.gmra.mxu0 %vm1109_vm2, %v2777_v50  ;;  %v651_v50 = vld [vmem:[%s4171_s9 + $0x8] sm:$0xff] }
 0x109   : > { %3085 = vmatprep.mubr.msk.f32.mxu0 %vm1109_vm2, %v2778_v51 }
 0x10c   : > { %3086 = vmatmul.mubr.msk.f32.gmra.mxu0 %vm1109_vm2, %v2779_v52 }
 0x10d   : > { %3088 = vmatprep.mubr.msk.f32.mxu0 %vm1109_vm2, %v2780_v53 }
 0x110   : > { %3089 = vmatmul.mubr.msk.f32.gmra.mxu0 %vm1109_vm2, %v2781_v54 }
 0x13f   : > { %v1025_v13 = vpop.xlane.xlu0 %1024 }
 0x140   : > { %v1031_v29 = vmul.f32 0.06666667, %v1025_v13 }
 0x142   : > { %v1028_v12 = vpop.xlane.xlu1 %1027  ;;  %v3782_v34 = vadd.f32 1e-05, %v1031_v29 }
 0x143   : > { %v1032_v18 = vmul.f32 0.06666667, %v1028_v12 }
 0x144   : > { %vm1053_vm7 = vcmp.eq.f32.partialorder %v3782_v34, inf  ;;  %v1056_v12 = vand.u32 2147483648, %v3782_v34  ;;  %vm1055_vm10 = vcmp.eq.f32.partialorder %v3782_v34, 0.0 }
 0x145   : > { %v1036_v31 = vadd.f32 1e-05, %v1032_v18 }
 0x146   : > { %v1022_v14 = vpop.xlane.xlu1 %1021  ;;  %v1019_v16 = vpop.xlane.xlu0 %1018 }
 0x147   : > { %v1030_v15 = vmul.f32 0.06666667, %v1022_v14  ;;  %v1029_v17 = vmul.f32 0.06666667, %v1019_v16  ;;  %vm1060_vm5 = vcmp.eq.f32.partialorder %v1036_v31, inf  ;;  %vm1062_vm9 = vcmp.eq.f32.partialorder %v1036_v31, 0.0 }
 0x149   : > { %v1034_v20 = vadd.f32 1e-05, %v1030_v15  ;;  %v1033_v30 = vadd.f32 1e-05, %v1029_v17 }
 0x14b   : > { %3218 = vrsqrt.f32 %v1034_v20  ;;  %vm1046_vm3 = vcmp.eq.f32.partialorder %v1034_v20, inf  ;;  %vm1039_vm4 = vcmp.eq.f32.partialorder %v1033_v30, inf  ;;  %vm1048_vm6 = vcmp.eq.f32.partialorder %v1034_v20, 0.0 }
 0x14c   : > { %3220 = vrsqrt.f32 %v1033_v30  ;;  %vm1041_vm8 = vcmp.eq.f32.partialorder %v1033_v30, 0.0 }
 0x14d   : > { %3222 = vrsqrt.f32 %v1036_v31 }
 0x14e   : > { %3224 = vrsqrt.f32 %v3782_v34 }
 0x158   : > { %v3785_v43 = vpop.eup %3218 }
 0x159   : > { %v3787_v45 = vpop.eup %3220  ;;  %v1045_v49 = vmul.f32 %v3785_v43, %v1034_v20 }
 0x15a   : > { %v3789_v47 = vpop.eup %3222  ;;  %v1038_v52 = vmul.f32 %v3787_v45, %v1033_v30 }
 0x15b   : > { %v3796_v53 = vpop.eup %3224 }
 0x172   : > { %v3010_v57 = vpop.f32.mrf.mxu1 }
 0x173   : > { %v950_v0 = vadd.f32 %v3010_v57, %v3515_v22  ;;  %v650_v57 = vld [vmem:[%s4171_s9] sm:$0xff] }
 0x174   : > { %v944_v58 = vpop.f32.mrf.mxu1 }
 0x175   : > { %v945_v1 = vadd.f32 %v944_v58, %v3526_v24  ;;  %v2798_v24 = vld [vmem:[%s4170_s8 + $0x60] sm:$0xff] }
 0x176   : > { %v3013_v59 = vpop.f32.mrf.mxu1 }
 0x177   : > { %v960_v60 = vadd.f32 %v3013_v59, %v3509_v21  ;;  %v628_v21 = vld [vmem:[%s4170_s8 + $0x10] sm:$0xff]  ;;  %v1049_v59 = vand.u32 2147483648, %v1034_v20 }
 0x178   : > { %v954_v61 = vpop.f32.mrf.mxu1 }
 0x179   : > { %v955_v62 = vadd.f32 %v954_v61, %v3521_v23  ;;  %3057 = vmatprep.subr.mxu1 %v960_v60  ;;  %v629_v23 = vld [vmem:[%s4170_s8 + $0x18] sm:$0xff] }
 0x17a   : > { %3058 = vmatpush3.msra.mxu1 %v960_v60  ;;  %v3016_v63 = vpop.f32.mrf.mxu1  ;;  %v1059_v60 = vmul.f32 %v3789_v47, %v1036_v31 }
 0x17b   : > { %3059 = vmatprep.subr.mxu1 %v955_v62  ;;  %v970_v9 = vadd.f32 %v3016_v63, %v3545_v27  ;;  %v2792_v27 = vld [vmem:[%s4170_s8 + $0x50] sm:$0xff]  ;;  %v1047_v63 = vsel %vm1046_vm3, %v1034_v20, %v1045_v49 }
 0x17c   : > { %3060 = vmatpush3.msra.mxu1 %v955_v62  ;;  %v964_v3 = vpop.f32.mrf.mxu1 }
 0x17d   : > { %3061 = vmatprep.subr.mxu1 %v950_v0 }
 0x17e   : > { %3062 = vmatpush3.msra.mxu1 %v950_v0  ;;  %v3019_v22 = vpop.f32.mrf.mxu1  ;;  %v653_v0 = vld [vmem:[%s4171_s9 + $0x18] sm:$0xff] }
 0x17f   : > { %3063 = vmatprep.subr.mxu1 %v945_v1  ;;  %v980_v4 = vadd.f32 %v3019_v22, %v3533_v25 }
 0x180   : > { %3064 = vmatpush3.msra.mxu1 %v945_v1  ;;  %v974_v5 = vpop.f32.mrf.mxu1 }
 0x181   : > { %3066 = vmatmul.mubr.msk.f32.vlgmr.msra.gmra.mxu1 %vm1109_vm2, %v627_v2  ;;  %3091 = vmatprep.subr.mxu1 %v3565_v36  ;;  %v975_v25 = vadd.f32 %v974_v5, %v3539_v26  ;;  %v965_v26 = vadd.f32 %v964_v3, %v3551_v28  ;;  %v2793_v28 = vld [vmem:[%s4170_s8 + $0x58] sm:$0xff]  ;;  %v1040_v2 = vsel %vm1039_vm4, %v1033_v30, %v1038_v52  ;;  %v1042_v3 = vand.u32 2147483648, %v1033_v30 }
 0x182   : > { %3092 = vmatpush3.msra.mxu1 %v3565_v36  ;;  %3068 = vmatprep.mubr.msk.f32.mxu1 %vm1109_vm2, %v628_v21  ;;  %v3778_v19 = vpop.f32.mrf.mxu1  ;;  %v1052_v21 = vmul.f32 %v3796_v53, %v3782_v34  ;;  %v2807_v52 = vld [vmem:[%s4171_s9 + $0x38] sm:$0xff] }
 0x183   : > { %3093 = vmatprep.subr.mxu1 %v3558_v33 }
 0x184   : > { %3094 = vmatpush3.msra.mxu1 %v3558_v33  ;;  %v3780_v32 = vpop.f32.mrf.mxu1 }
 0x185   : > { %3069 = vmatmul.mubr.msk.f32.gmra.mxu1 %vm1109_vm2, %v629_v23  ;;  %3095 = vmatprep.subr.mxu1 %v3568_v38 }
 0x186   : > { %3096 = vmatpush3.msra.mxu1 %v3568_v38  ;;  %3099 = vmatprep.mubr.msk.f32.mxu1 %vm1109_vm2, %v2798_v24  ;;  %v3053_v37 = vpop.f32.mrf.mxu1 }
 0x187   : > { %3097 = vmatprep.subr.mxu1 %v3584_v44 }
 0x188   : > { %3098 = vmatpush3.msra.mxu1 %v3584_v44  ;;  %v1317_v39 = vpop.f32.mrf.mxu1 }
 0x189   : > { %3100 = vmatmul.mubr.msk.f32.vlgmr.msra.gmra.mxu1 %vm1109_vm2, %v2799_v6  ;;  %3105 = vmatprep.subr.mxu1 %v980_v4  ;;  %v1050_v6 = vsel %vm1048_vm6, %v1049_v59, %v1047_v63 }
 0x18a   : > { %3106 = vmatpush3.msra.mxu1 %v980_v4  ;;  %3102 = vmatprep.mubr.msk.f32.mxu1 %vm1109_vm2, %v2800_v7  ;;  %v3056_v41 = vpop.f32.mrf.mxu1  ;;  %v652_v4 = vld [vmem:[%s4171_s9 + $0x10] sm:$0xff]  ;;  %v1061_v7 = vsel %vm1060_vm5, %v1036_v31, %v1059_v60 }
 0x18b   : > { %3107 = vmatprep.subr.mxu1 %v975_v25  ;;  %v2806_v60 = vld [vmem:[%s4171_s9 + $0x30] sm:$0xff] }
 0x18c   : > { %3108 = vmatpush3.msra.mxu1 %v975_v25  ;;  %v1327_v46 = vpop.f32.mrf.mxu1  ;;  %v1063_v25 = vand.u32 2147483648, %v1036_v31 }
 0x18d   : > { %3103 = vmatmul.mubr.msk.f32.gmra.mxu1 %vm1109_vm2, %v2801_v8  ;;  %3109 = vmatprep.subr.mxu1 %v970_v9 }
 0x18e   : > { %3110 = vmatpush3.msra.mxu1 %v970_v9  ;;  %3113 = vmatprep.mubr.msk.f32.mxu1 %vm1109_vm2, %v2790_v10  ;;  %v1064_v17 = vsel %vm1062_vm9, %v1063_v25, %v1061_v7  ;;  %v2786_v25 = vld [vmem:[%s4167_s5 + $0x60] sm:$0xff] }
 0x18f   : > { %3111 = vmatprep.subr.mxu1 %v965_v26 }
 0x190   : > { %3112 = vmatpush3.msra.mxu1 %v965_v26 }
 0x191   : > { %3114 = vmatmul.mubr.msk.f32.vlgmr.msra.gmra.mxu1 %vm1109_vm2, %v2791_v11 }
 0x192   : > { %3116 = vmatprep.mubr.msk.f32.mxu1 %vm1109_vm2, %v2792_v27  ;;  %v1043_v27 = vsel %vm1041_vm8, %v1042_v3, %v1040_v2 }
 0x195   : > { %3117 = vmatmul.mubr.msk.f32.gmra.mxu1 %vm1109_vm2, %v2793_v28  ;;  %v1054_v28 = vsel %vm1053_vm7, %v3782_v34, %v1052_v21  ;;  %v2805_v34 = vld [vmem:[%s4171_s9 + $0x28] sm:$0xff] }
 0x196   : > { %v1057_v30 = vsel %vm1055_vm10, %v1056_v12, %v1054_v28  ;;  %v665_v12 = vld [vmem:[%s4176_s14] sm:$0xff] }
 0x241   : > { %v3067_v51 = vpop.f32.mrf.mxu1 }
 0x242   : > { %v1420_v54 = vadd.f32 %v3067_v51, %v3053_v37 }
 0x243   : > { %v1414_v58 = vpop.f32.mrf.mxu1 }
 0x244   : > { %v3802_v61 = vadd.f32 %v1420_v54, %v651_v50  ;;  %v1415_v62 = vadd.f32 %v1414_v58, %v1317_v39 }
 0x245   : > { %v3070_v1 = vpop.f32.mrf.mxu1 }
 0x246   : > { %v4191_v22 = vsub.f32 1.0, %v3802_v61  ;;  %v3811_v23 = vadd.f32 %v1415_v62, %v650_v57  ;;  %v1430_v24 = vadd.f32 %v3070_v1, %v3056_v41 }
 0x247   : > { %v1424_v5 = vpop.f32.mrf.mxu1 }
 0x248   : > { %v4190_v8 = vsub.f32 1.0, %v3811_v23  ;;  %v3818_v9 = vadd.f32 %v1430_v24, %v653_v0  ;;  %v1425_v10 = vadd.f32 %v1424_v5, %v1327_v46  ;;  %v3822_v26 = vmul.f32 %v4191_v22, %v1050_v6  ;;  %v2804_v46 = vld [vmem:[%s4171_s9 + $0x20] sm:$0xff] }
 0x249   : > { %v3101_v11 = vpop.f32.mrf.mxu1 }
 0x24a   : > { %v4193_v13 = vsub.f32 1.0, %v3818_v9  ;;  %v3829_v14 = vadd.f32 %v1425_v10, %v652_v4  ;;  %v3834_v15 = vmul.f32 %v4190_v8, %v1043_v27 }
 0x24b   : > { %v1800_v16 = vpop.f32.mrf.mxu1 }
 0x24c   : > { %v4192_v18 = vsub.f32 1.0, %v3829_v14  ;;  %v3839_v20 = vmul.f32 %v4193_v13, %v1064_v17 }
 0x24d   : > { %v3104_v29 = vpop.f32.mrf.mxu1 }
 0x24e   : > { %v3843_v31 = vmul.f32 %v4192_v18, %v1057_v30 }
 0x24f   : > { %v1810_v37 = vpop.f32.mrf.mxu1 }
 0x251   : > { %v3115_v39 = vpop.f32.mrf.mxu1 }
 0x252   : > { %v1903_v41 = vadd.f32 %v3115_v39, %v3101_v11 }
 0x253   : > { %v1897_v49 = vpop.f32.mrf.mxu1 }
 0x254   : > { %v1917_v50 = vadd.f32 %v2805_v34, %v1903_v41  ;;  %v1898_v51 = vadd.f32 %v1897_v49, %v1800_v16  ;;  %v663_v16 = vld [vmem:[%s4175_s13] sm:$0xff] }
 0x255   : > { %v3118_v54 = vpop.f32.mrf.mxu1  ;;  %3127 = vmatprep.mubr.msk.f32.mxu0 %vm1109_vm2, %v663_v16 }
 0x256   : > { %v1945_v57 = vsub.f32 1.0, %v1917_v50  ;;  %v1916_v58 = vadd.f32 %v2804_v46, %v1898_v51  ;;  %v1913_v59 = vadd.f32 %v3118_v54, %v3104_v29  ;;  %1927 = vperm.xlu0 %3217, %v1917_v50   ;;  %v1571_v46 = vpop.permute.xlu1 %1570  ;;  %v1566_v50 = vpop.permute.xlu0 %1565 }
 0x257   : > { %v1907_v62 = vpop.f32.mrf.mxu1 }
 0x258   : > { %v1919_v63 = vadd.f32 %v2807_v52, %v1913_v59  ;;  %v1908_v0 = vadd.f32 %v1907_v62, %v1810_v37  ;;  %1922 = vperm.xlu1 %3216, %v1916_v58   ;;  %v1949_v1 = vmul.f32 %v1945_v57, %v1050_v6  ;;  %v1944_v21 = vsub.f32 1.0, %v1916_v58 }
 0x259   : > { %v1981_v10 = vmul.f32 %v1945_v57, %v3568_v38 }
 0x25a   : > { %v1947_v2 = vsub.f32 1.0, %v1919_v63  ;;  %v1918_v3 = vadd.f32 %v2806_v60, %v1908_v0  ;;  %1959 = vperm.xlu0 %3217, %v1949_v1   ;;  %v1948_v5 = vmul.f32 %v1944_v21, %v1043_v27  ;;  %v666_v27 = vld [vmem:[%s4176_s14 + $0x8] sm:$0xff]  ;;  %v1980_v28 = vmul.f32 %v1944_v21, %v3584_v44  ;;  %v1561_v51 = vpop.permute.xlu1 %1560  ;;  %v1556_v54 = vpop.permute.xlu0 %1555 }
 0x25c   : > { %1937 = vperm.xlu1 %3216, %v1919_v63   ;;  %v1946_v24 = vsub.f32 1.0, %v1918_v3  ;;  %v1951_v4 = vmul.f32 %v1947_v2, %v1064_v17  ;;  %v1983_v6 = vmul.f32 %v1947_v2, %v3565_v36  ;;  %v3874_v17 = vpop.f32.mrf.mxu0 }
 0x25e   : > { %1932 = vperm.xlu0 %3217, %v1918_v3   ;;  %v1950_v7 = vmul.f32 %v1946_v24, %v1057_v30  ;;  %v1982_v11 = vmul.f32 %v1946_v24, %v3558_v33  ;;  %v3876_v29 = vpop.f32.mrf.mxu0  ;;  %v1591_v58 = vpop.permute.xlu1 %1590 }
 0x25f   : > { %v1586_v60 = vpop.permute.xlu0 %1585 }
 0x260   : > { %1969 = vperm.xlu1 %3216, %v1951_v4   ;;  %v3878_v30 = vpop.f32.mrf.mxu0 }
 0x262   : > { %1954 = vperm.xlu0 %3217, %v1948_v5   ;;  %v3880_v37 = vpop.f32.mrf.mxu0  ;;  %v1581_v62 = vpop.permute.xlu1 %1580 }
 0x264   : > { %1964 = vperm.xlu1 %3216, %v1950_v7   ;;  %v3882_v34 = vpop.f32.mrf.mxu0 }
 0x266   : > { %1575 = vperm.xlu0 %3217, %v2786_v25   ;;  %v3884_v39 = vpop.f32.mrf.mxu0 }
 0x267   : > { %4213 = vst [vmem:[#allocation15_spill] sm:$0xff] %v3884_v39 }
 0x268   : > { %2001 = vperm.xlu1 %3216, %v1983_v6   ;;  %v3886_v41 = vpop.f32.mrf.mxu0 }
 0x26a   : > { %1991 = vperm.xlu0 %3217, %v1981_v10   ;;  %v3888_v49 = vpop.f32.mrf.mxu0 }
 0x26c   : > { %1996 = vperm.xlu1 %3216, %v1982_v11   ;;  %v3081_v52 = vpop.f32.mrf.mxu0 }
 0x26d   : > { %v1689_v21 = vadd.f32 %v3081_v52, %v1561_v51 }
 0x26e   : > { %2043 = vperm.xlu0 %3217, %v666_v27   ;;  %v1683_v57 = vpop.f32.mrf.mxu0 }
 0x26f   : > { %v1684_v11 = vadd.f32 %v1683_v57, %v1556_v54 }
 0x270   : > { %1986 = vperm.xlu1 %3216, %v1980_v28   ;;  %v3084_v59 = vpop.f32.mrf.mxu0 }
 0x271   : > { %v1699_v4 = vadd.f32 %v3084_v59, %v1571_v46 }
 0x272   : > { %v1693_v63 = vpop.f32.mrf.mxu0 }
 0x273   : > { %v1694_v28 = vadd.f32 %v1693_v63, %v1566_v50 }
 0x274   : > { %2038 = vperm.xlu1 %3216, %v665_v12   ;;  %v3087_v2 = vpop.f32.mrf.mxu0 }
 0x276   : > { %v1703_v7 = vpop.f32.mrf.mxu0 }
 0x278   : > { %v3090_v16 = vpop.f32.mrf.mxu0 }
 0x279   : > { %v1719_v51 = vadd.f32 %v3090_v16, %v1591_v58 }
 0x27a   : > { %v1713_v52 = vpop.f32.mrf.mxu0 }
 0x27b   : > { %v1714_v63 = vadd.f32 %v1713_v52, %v1586_v60 }
 0x2d1   : > { %v1928_v0 = vpop.permute.xlu0 %1927 }
 0x2d2   : > { %v1941_v5 = vmul.f32 %v1928_v0, %v1689_v21 }
 0x2d3   : > { %v1923_v1 = vpop.permute.xlu1 %1922 }
 0x2d4   : > { %v1940_v8 = vmul.f32 %v1923_v1, %v1684_v11 }
 0x2d5   : > { %v1960_v3 = vpop.permute.xlu0 %1959 }
 0x2d6   : > { %v1973_v6 = vadd.f32 %v1960_v3, %v1941_v5  ;;  %v1709_v3 = vadd.f32 %v3087_v2, %v1581_v62 }
 0x2d7   : > { %v1938_v24 = vpop.permute.xlu1 %1937 }
 0x2d8   : > { %v1943_v10 = vmul.f32 %v1938_v24, %v1699_v4  ;;  %v2009_v18 = vadd.f32 1.0, %v1973_v6  ;;  %v1979_v57 = vmul.f32 %v1938_v24, %v1719_v51 }
 0x2d9   : > { %v1933_v25 = vpop.permute.xlu0 %1932 }
 0x2da   : > { %v1942_v13 = vmul.f32 %v1933_v25, %v1694_v28  ;;  %v2013_v54 = vmul.f32 %v3785_v43, %v2009_v18  ;;  %v1978_v58 = vmul.f32 %v1933_v25, %v1714_v63 }
 0x2db   : > { %v1970_v27 = vpop.permute.xlu1 %1969 }
 0x2dc   : > { %v1975_v12 = vadd.f32 %v1970_v27, %v1943_v10  ;;  %v1977_v10 = vmul.f32 %v1928_v0, %v1709_v3 }
 0x2dd   : > { %v1955_v22 = vpop.permute.xlu0 %1954 }
 0x2de   : > { %v2011_v39 = vadd.f32 1.0, %v1975_v12  ;;  %v1972_v44 = vadd.f32 %v1955_v22, %v1940_v8 }
 0x2df   : > { %v1965_v38 = vpop.permute.xlu1 %1964 }
 0x2e0   : > { %v2015_v46 = vmul.f32 %v3789_v47, %v2011_v39  ;;  %v1974_v59 = vadd.f32 %v1965_v38, %v1942_v13  ;;  %v2008_v4 = vadd.f32 1.0, %v1972_v44  ;;  %v2017_v38 = vmul.f32 %v2013_v54, %v3579_v42  ;;  %v664_v54 = vld [vmem:[%s4175_s13 + $0x8] sm:$0xff] }
 0x2e1   : > { %v1576_v21 = vpop.permute.xlu0 %1575 }
 0x2e2   : > { %v2010_v50 = vadd.f32 1.0, %v1974_v59  ;;  %v2019_v22 = vmul.f32 %v2015_v46, %v3574_v40  ;;  %v1704_v27 = vadd.f32 %v1703_v7, %v1576_v21  ;;  %v2012_v18 = vmul.f32 %v3787_v45, %v2008_v4 }
 0x2e3   : > { %v2002_v5 = vpop.permute.xlu1 %2001 }
 0x2e4   : > { %v2014_v6 = vmul.f32 %v3796_v53, %v2010_v50  ;;  %v2007_v8 = vadd.f32 %v2002_v5, %v1979_v57  ;;  %v1976_v12 = vmul.f32 %v1923_v1, %v1704_v27  ;;  %v2016_v7 = vmul.f32 %v2012_v18, %v3595_v48  ;;  %v601_v27 = vld [vmem:[%s4168_s6] sm:$0xff] }
 0x2e5   : > { %v1992_v11 = vpop.permute.xlu0 %1991  ;;  %3134 = vmatprep.mubr.msk.f32.mxu1 %vm872_vm1, %v601_v27 }
 0x2e6   : > { %v2023_v39 = vadd.f32 %v2019_v22, %v2007_v8  ;;  %v2005_v13 = vadd.f32 %v1992_v11, %v1977_v10  ;;  %v2018_v60 = vmul.f32 %v2014_v6, %v3561_v35  ;;  %v2802_v8 = vld [vmem:[%s4172_s10 + $0x10] sm:$0xff]  ;;  %v583_v11 = vld [vmem:[%s4165_s3 + $0x48] sm:$0xff] }
 0x2e7   : > { %v1997_v62 = vpop.permute.xlu1 %1996 }
 0x2e8   : > { %v2021_v44 = vadd.f32 %v2017_v38, %v2005_v13  ;;  %v2006_v2 = vadd.f32 %v1997_v62, %v1978_v58  ;;  %vm2027_vm11 = vcmp.ge.f32.partialorder %v2023_v39, 0.0  ;;  %v2031_v0 = vmul.f32 0.2, %v2023_v39  ;;  %v582_v58 = vld [vmem:[%s4165_s3 + $0x40] sm:$0xff] }
 0x2e9   : > { %v2044_v57 = vpop.permute.xlu0 %2043 }
 0x2ea   : > { %v2022_v24 = vadd.f32 %v2018_v60, %v2006_v2  ;;  %v2035_v28 = vsel %vm2027_vm11, %v2023_v39, %v2031_v0  ;;  %v2029_v52 = vmul.f32 0.2, %v2021_v44  ;;  %vm2025_vm13 = vcmp.ge.f32.partialorder %v2021_v44, 0.0  ;;  %v2803_v60 = vld [vmem:[%s4172_s10 + $0x18] sm:$0xff] }
 0x2eb   : > { %3119 = vmatprep.subr.mxu0 %v2035_v28  ;;  %v1987_v25 = vpop.permute.xlu1 %1986 }
 0x2ec   : > { %v2004_v16 = vadd.f32 %v1987_v25, %v1976_v12  ;;  %3120 = vmatpush3.msra.mxu0 %v2035_v28  ;;  %vm2026_vm12 = vcmp.ge.f32.partialorder %v2022_v24, 0.0  ;;  %v2030_v51 = vmul.f32 0.2, %v2022_v24  ;;  %v2033_v21 = vsel %vm2025_vm13, %v2021_v44, %v2029_v52 }
 0x2ed   : > { %v990_v44 = vadd.f32 %v3778_v19, %v583_v11  ;;  %v985_v28 = vadd.f32 %v3780_v32, %v582_v58 }
 0x2ee   : > { %v2020_v46 = vadd.f32 %v2016_v7, %v2004_v16  ;;  %v2034_v59 = vsel %vm2026_vm12, %v2022_v24, %v2030_v51  ;;  %v635_v24 = vld [vmem:[%s4172_s10] sm:$0xff]  ;;  %v636_v16 = vld [vmem:[%s4172_s10 + $0x8] sm:$0xff] }
 0x2ef   : > { %3121 = vmatprep.subr.mxu0 %v2034_v59  ;;  %v2039_v4 = vpop.permute.xlu1 %2038 }
 0x2f0   : > { %3122 = vmatpush3.msra.mxu0 %v2034_v59  ;;  %vm2024_vm14 = vcmp.ge.f32.partialorder %v2020_v46, 0.0  ;;  %v2028_v3 = vmul.f32 0.2, %v2020_v46  ;;  %v607_v59 = vld [vmem:[%s4167_s5 + $0x10] sm:$0xff] }
 0x2f1   : > { %3123 = vmatprep.subr.mxu0 %v2033_v21 }
 0x2f2   : > { %3124 = vmatpush3.msra.mxu0 %v2033_v21  ;;  %v2032_v1 = vsel %vm2024_vm14, %v2020_v46, %v2028_v3  ;;  %v602_v46 = vld [vmem:[%s4168_s6 + $0x8] sm:$0xff]  ;;  %v608_v21 = vld [vmem:[%s4167_s5 + $0x18] sm:$0xff] }
 0x2f3   : > { %3125 = vmatprep.subr.mxu0 %v2032_v1  ;;  %v623_v3 = vld [vmem:[%s4169_s7 + $0x8] sm:$0xff] }
 0x2f4   : > { %3126 = vmatpush3.msra.mxu0 %v2032_v1  ;;  %v606_v1 = vld [vmem:[%s4167_s5 + $0x8] sm:$0xff] }
 0x2f5   : > { %3128 = vmatmul.mubr.msk.f32.vlgmr.msra.gmra.mxu0 %vm1109_vm2, %v664_v54  ;;  %v622_v54 = vld [vmem:[%s4169_s7] sm:$0xff] }
 0x2f6   : > { %3144 = vmatprep.mubr.msk.f32.mxu0 %vm872_vm1, %v2802_v8 }
 0x3b5   : > { %v3129_v50 = vpop.f32.mrf.mxu0 }
 0x3b6   : > { %v2124_v63 = vadd.f32 %v3129_v50, %v2044_v57  ;;  %v605_v57 = vld [vmem:[%s4167_s5] sm:$0xff]  ;;  %v612_v50 = vld [vmem:[%s4167_s5 + $0x38] sm:$0xff] }
 0x3b7   : > { %v2118_v5 = vpop.f32.mrf.mxu0 }
 0x3b8   : > { %v2119_v10 = vadd.f32 %v2118_v5, %v2039_v4  ;;  %v2130_v6 = vsel %vm872_vm1, %v2124_v63, 0.0  ;;  %v610_v4 = vld [vmem:[%s4167_s5 + $0x28] sm:$0xff] }
 0x3b9   : > { %2131 = vadd.xlane.f32.xlu0 %v2130_v6 }
 0x3ba   : > { %v2127_v22 = vsel %vm872_vm1, %v2119_v10, 0.0 }
 0x3bb   : > { %2128 = vadd.xlane.f32.xlu1 %v2127_v22 }
 0x3cc   : > { %718 = vperm.xlu1 %3216, %v582_v58  }
 0x3cf   : > { %723 = vperm.xlu0 %3217, %v583_v11  }
 0x442   : > { %v2132_v39 = vpop.xlane.xlu0 %2131 }
 0x443   : > { %v3918_v38 = vmul.f32 0.0625, %v2132_v39 }
 0x444   : > { %v2129_v13 = vpop.xlane.xlu1 %2128 }
 0x445   : > { %v3920_v18 = vmul.f32 0.0625, %v2129_v13  ;;  %3140 = vmatprep.subr.mxu0 %v3918_v38  ;;  %v3924_v62 = vsub.f32 %v2124_v63, %v3918_v38  ;;  %v611_v63 = vld [vmem:[%s4167_s5 + $0x30] sm:$0xff] }
 0x446   : > { %3141 = vmatpush3.msra.mxu0 %v3918_v38 }
 0x447   : > { %3142 = vmatprep.subr.mxu0 %v3920_v18  ;;  %v2138_v2 = vmul.f32 %v3924_v62, %v3924_v62  ;;  %v3935_v0 = vsub.f32 %v2119_v10, %v3920_v18  ;;  %v4215_v10 = vsub.f32 1.0, %v3829_v14 }
 0x448   : > { %3143 = vmatpush3.msra.mxu0 %v3920_v18  ;;  %v719_v25 = vpop.permute.xlu1 %718 }
 0x449   : > { %3145 = vmatmul.mubr.msk.f32.vlgmr.msra.gmra.mxu0 %vm872_vm1, %v2803_v60  ;;  %3147 = vmatprep.subr.mxu0 %v990_v44  ;;  %v2142_v19 = vsel %vm872_vm1, %v2138_v2, 0.0  ;;  %v2137_v12 = vmul.f32 %v3935_v0, %v3935_v0  ;;  %v864_v52 = vadd.f32 %v3716_v56, %v719_v25  ;;  %v604_v56 = vld [vmem:[%s4168_s6 + $0x18] sm:$0xff]  ;;  %v1499_v6 = vmul.f32 %v4215_v10, %v3558_v33 }
 0x44a   : > { %3148 = vmatpush3.msra.mxu0 %v990_v44  ;;  %2143 = vadd.xlane.f32.xlu0 %v2142_v19  ;;  %v724_v7 = vpop.permute.xlu0 %723 }
 0x44b   : > { %v869_v51 = vadd.f32 %v3714_v55, %v724_v7  ;;  %3149 = vmatprep.subr.mxu0 %v985_v28  ;;  %v2139_v32 = vsel %vm872_vm1, %v2137_v12, 0.0  ;;  %3151 = vmatprep.mubr.msk.f32.mxu0 %vm872_vm1, %v635_v24  ;;  %v603_v55 = vld [vmem:[%s4168_s6 + $0x10] sm:$0xff] }
 0x44c   : > { %2140 = vadd.xlane.f32.xlu1 %v2139_v32  ;;  %3150 = vmatpush3.msra.mxu0 %v985_v28 }
 0x44d   : > { %3130 = vmatprep.subr.mxu1 %v869_v51  ;;  %3152 = vmatmul.mubr.msk.f32.vlgmr.msra.gmra.mxu0 %vm872_vm1, %v636_v16 }
 0x44e   : > { %3131 = vmatpush3.msra.mxu1 %v869_v51 }
 0x44f   : > { %3132 = vmatprep.subr.mxu1 %v864_v52 }
 0x450   : > { %3133 = vmatpush3.msra.mxu1 %v864_v52 }
 0x451   : > { %3135 = vmatmul.mubr.msk.f32.vlgmr.msra.gmra.mxu1 %vm872_vm1, %v602_v46 }
 0x452   : > { %3137 = vmatprep.mubr.msk.f32.mxu1 %vm872_vm1, %v603_v55 }
 0x455   : > { %3138 = vmatmul.mubr.msk.f32.gmra.mxu1 %vm872_vm1, %v604_v56 }
 0x45d   : > { %1081 = vperm.xlu1 %3216, %v607_v59  }
 0x460   : > { %1086 = vperm.xlu0 %3217, %v608_v21  }
 0x461   : > { %2172 = vperm.xlu1 %3216, %v623_v3  }
 0x464   : > { %1454 = vperm.xlu0 %3217, %v3818_v9  }
 0x465   : > { %1449 = vperm.xlu1 %3216, %v3829_v14  }
 0x468   : > { %1076 = vperm.xlu0 %3217, %v606_v1  }
 0x469   : > { %2167 = vperm.xlu1 %3216, %v622_v54  }
 0x46c   : > { %1486 = vperm.xlu0 %3217, %v3839_v20   ;;  %v625_v20 = vld [vmem:[%s4169_s7 + $0x18] sm:$0xff] }
 0x46d   : > { %1071 = vperm.xlu1 %3216, %v605_v57  }
 0x470   : > { %1106 = vperm.xlu0 %3217, %v612_v50  }
 0x471   : > { %1444 = vperm.xlu1 %3216, %v3802_v61  }
 0x474   : > { %1481 = vperm.xlu0 %3217, %v3843_v31   ;;  %v624_v31 = vld [vmem:[%s4169_s7 + $0x10] sm:$0xff] }
 0x475   : > { %1101 = vperm.xlu1 %3216, %v611_v63  }
 0x478   : > { %1439 = vperm.xlu0 %3217, %v3811_v23  }
 0x479   : > { %1476 = vperm.xlu1 %3216, %v3822_v26   ;;  %v4214_v26 = vsub.f32 1.0, %v3818_v9 }
 0x47b   : > { %v1500_v5 = vmul.f32 %v4214_v26, %v3565_v36 }
 0x47c   : > { %2182 = vperm.xlu0 %3217, %v625_v20  }
 0x47d   : > { %1471 = vperm.xlu1 %3216, %v3834_v15   ;;  %v609_v15 = vld [vmem:[%s4167_s5 + $0x20] sm:$0xff] }
 0x480   : > { %1096 = vperm.xlu0 %3217, %v610_v4  }
 0x481   : > { %2177 = vperm.xlu1 %3216, %v624_v31  }
 0x484   : > { %1518 = vperm.xlu0 %3217, %v1500_v5  }
 0x485   : > { %1513 = vperm.xlu1 %3216, %v1499_v6  }
 0x488   : > { %1091 = vperm.xlu0 %3217, %v609_v15  }
 0x4d3   : > { %v2144_v8 = vpop.xlane.xlu0 %2143 }
 0x4d4   : > { %v2146_v32 = vmul.f32 0.06666667, %v2144_v8 }
 0x4d5   : > { %v2141_v22 = vpop.xlane.xlu1 %2140 }
 0x4d9   : > { %v1082_v58 = vpop.permute.xlu1 %1081 }
 0x4da   : > { %v1211_v25 = vadd.f32 %v3880_v37, %v1082_v58 }
 0x4db   : > { %v1087_v11 = vpop.permute.xlu0 %1086 }
 0x4dc   : > { %v1216_v19 = vadd.f32 %v3878_v30, %v1087_v11  ;;  %v2148_v30 = vadd.f32 1e-05, %v2146_v32 }
 0x4dd   : > { %v4016_v27 = vpop.permute.xlu1 %2172 }
 0x4de   : > { %3226 = vrsqrt.f32 %v2148_v30  ;;  %vm2158_vm3 = vcmp.eq.f32.partialorder %v2148_v30, inf  ;;  %v2161_v32 = vand.u32 2147483648, %v2148_v30  ;;  %vm2160_vm5 = vcmp.eq.f32.partialorder %v2148_v30, 0.0 }
 0x4df   : > { %v1455_v39 = vpop.permute.xlu0 %1454 }
 0x4e0   : > { %v1460_v7 = vmul.f32 %v1455_v39, %v1216_v19  ;;  %v659_v19 = vld [vmem:[%s4173_s11] sm:$0xff] }
 0x4e1   : > { %v1450_v9 = vpop.permute.xlu1 %1449 }
 0x4e2   : > { %v1459_v52 = vmul.f32 %v1450_v9, %v1211_v25 }
 0x4e3   : > { %v1077_v36 = vpop.permute.xlu0 %1076 }
 0x4e4   : > { %v1206_v44 = vadd.f32 %v3874_v17, %v1077_v36  ;;  %v2145_v17 = vmul.f32 0.06666667, %v2141_v22 }
 0x4e5   : > { %v4018_v13 = vpop.permute.xlu1 %2167 }
 0x4e6   : > { %v4031_v54 = vadd.f32 1e-05, %v2145_v17 }
 0x4e7   : > { %v1487_v14 = vpop.permute.xlu0 %1486 }
 0x4e8   : > { %v1492_v46 = vadd.f32 %v1487_v14, %v1460_v7  ;;  %3228 = vrsqrt.f32 %v4031_v54  ;;  %vm2151_vm4 = vcmp.eq.f32.partialorder %v4031_v54, inf  ;;  %v2154_v17 = vand.u32 2147483648, %v4031_v54 }
 0x4e9   : > { %v1072_v33 = vpop.permute.xlu1 %1071  ;;  %vm2153_vm6 = vcmp.eq.f32.partialorder %v4031_v54, 0.0 }
 0x4ea   : > { %v1201_v16 = vadd.f32 %v3876_v29, %v1072_v33  ;;  %v1528_v1 = vadd.f32 1.0, %v1492_v46 }
 0x4eb   : > { %v1107_v60 = vpop.permute.xlu0 %1106 }
 0x4ec   : > { %v1236_v29 = vadd.f32 %v3886_v41, %v1107_v60  ;;  %v1532_v20 = vmul.f32 %v3789_v47, %v1528_v1 }
 0x4ed   : > { %v1445_v2 = vpop.permute.xlu1 %1444 }
 0x4ee   : > { %v1458_v24 = vmul.f32 %v1445_v2, %v1206_v44  ;;  %v1496_v10 = vmul.f32 %v1455_v39, %v1236_v29  ;;  %v1536_v15 = vmul.f32 %v1532_v20, %v3574_v40  ;;  %v4047_v39 = vpop.eup %3226 }
 0x4ef   : > { %v1482_v28 = vpop.permute.xlu0 %1481  ;;  %v2157_v44 = vmul.f32 %v4047_v39, %v2148_v30 }
 0x4f0   : > { %v1491_v59 = vadd.f32 %v1482_v28, %v1459_v52 }
 0x4f1   : > { %v1102_v12 = vpop.permute.xlu1 %1101 }
 0x4f2   : > { %v1527_v57 = vadd.f32 1.0, %v1491_v59  ;;  %v1231_v4 = vadd.f32 %v3888_v49, %v1102_v12 }
 0x4f3   : > { %v4024_v51 = vpop.permute.xlu0 %1439 }
 0x4f4   : > { %v1457_v55 = vmul.f32 %v4024_v51, %v1201_v16  ;;  %v1531_v5 = vmul.f32 %v3796_v53, %v1527_v57  ;;  %v1495_v8 = vmul.f32 %v1450_v9, %v1231_v4  ;;  %v2159_v16 = vsel %vm2158_vm3, %v2148_v30, %v2157_v44 }
 0x4f5   : > { %v1477_v56 = vpop.permute.xlu1 %1476  ;;  %v4049_v40 = vpop.eup %3228  ;;  %v4217_v30 = vsub.f32 1.0, %v3802_v61  ;;  %v667_v61 = vld [vmem:[%s4177_s15] sm:$0xff] }
 0x4f6   : > { %v4027_v21 = vadd.f32 %v1477_v56, %v1458_v24  ;;  %v1535_v49 = vmul.f32 %v1531_v5, %v3561_v35  ;;  %v660_v35 = vld [vmem:[%s4173_s11 + $0x8] sm:$0xff]  ;;  %v2150_v28 = vmul.f32 %v4049_v40, %v4031_v54  ;;  %v2162_v56 = vsel %vm2160_vm5, %v2161_v32, %v2159_v16  ;;  %3158 = vmatprep.mubr.msk.f32.mxu1 %vm872_vm1, %v667_v61 }
 0x4f7   : > { %v4029_v3 = vpop.permute.xlu0 %2182  ;;  %v4219_v5 = vsub.f32 1.0, %v3811_v23  ;;  %v661_v23 = vld [vmem:[%s4174_s12] sm:$0xff] }
 0x4f8   : > { %3169 = vmatprep.mubr.msk.f32.mxu0 %vm1109_vm2, %v661_v23 }
 0x4f9   : > { %v1472_v37 = vpop.permute.xlu1 %1471 }
 0x4fa   : > { %v4034_v50 = vadd.f32 %v1472_v37, %v1457_v55  ;;  %v2152_v55 = vsel %vm2151_vm4, %v4031_v54, %v2150_v28  ;;  %v669_v54 = vld [vmem:[%s4178_s16] sm:$0xff] }
 0x4fb   : > { %v1097_v63 = vpop.permute.xlu0 %1096  ;;  %v2155_v37 = vsel %vm2153_vm6, %v2154_v17, %v2152_v55 }
 0x4fc   : > { %v1226_v31 = vadd.f32 %v3882_v34, %v1097_v63  ;;  %v4216_v63 = vld [vmem:[#allocation13_spill] sm:$0xff] }
 0x4fd   : > { %v4039_v26 = vpop.permute.xlu1 %2177  ;;  %v1498_v20 = vmul.f32 %v4217_v30, %v4216_v63 }
 0x4fe   : > { %v4043_v6 = vmul.f32 %v1445_v2, %v1226_v31  ;;  %v4218_v31 = vld [vmem:[#allocation14_spill] sm:$0xff] }
 0x4ff   : > { %v1519_v41 = vpop.permute.xlu0 %1518 }
 0x500   : > { %v1524_v22 = vadd.f32 %v1519_v41, %v1496_v10  ;;  %v1497_v10 = vmul.f32 %v4219_v5, %v4218_v31 }
 0x501   : > { %v1514_v58 = vpop.permute.xlu1 %1513 }
 0x502   : > { %v1540_v47 = vadd.f32 %v1536_v15, %v1524_v22  ;;  %v1523_v11 = vadd.f32 %v1514_v58, %v1495_v8 }
 0x503   : > { %v1092_v41 = vpop.permute.xlu0 %1091 }
 0x504   : > { %v1539_v34 = vadd.f32 %v1535_v49, %v1523_v11  ;;  %vm1544_vm15 = vcmp.ge.f32.partialorder %v1540_v47, 0.0  ;;  %v1548_v36 = vmul.f32 0.2, %v1540_v47 }
 0x506   : > { %v1552_v14 = vsel %vm1544_vm15, %v1540_v47, %v1548_v36  ;;  %vm1543_vm0 = vcmp.ge.f32.partialorder %v1539_v34, 0.0  ;;  %v1547_v33 = vmul.f32 0.2, %v1539_v34  ;;  %v1526_v47 = vadd.f32 1.0, %v4027_v21 }
 0x507   : > { %3161 = vmatprep.subr.mxu0 %v1552_v14 }
 0x508   : > { %3162 = vmatpush3.msra.mxu0 %v1552_v14  ;;  %v1551_v53 = vsel %vm1543_vm0, %v1539_v34, %v1547_v33 }
 0x509   : > { %v3146_v60 = vpop.f32.mrf.mxu0  ;;  %3163 = vmatprep.subr.mxu0 %v1551_v53 }
 0x50a   : > { %3164 = vmatpush3.msra.mxu0 %v1551_v53 }
 0x50b   : > { %v2354_v9 = vpop.f32.mrf.mxu0 }
 0x50d   : > { %v3153_v2 = vpop.f32.mrf.mxu0 }
 0x50e   : > { %v2441_v24 = vadd.f32 %v3153_v2, %v3146_v60  ;;  %v1530_v60 = vmul.f32 %v3785_v43, %v1526_v47 }
 0x50f   : > { %v2435_v12 = vpop.f32.mrf.mxu0 }
 0x510   : > { %v2445_v25 = vadd.f32 %v2441_v24, %v660_v35  ;;  %v2436_v7 = vadd.f32 %v2435_v12, %v2354_v9  ;;  %v1525_v9 = vadd.f32 1.0, %v4034_v50  ;;  %v4220_v24 = vld [vmem:[#allocation15_spill] sm:$0xff]  ;;  %v1534_v50 = vmul.f32 %v1530_v60, %v3579_v42 }
 0x511   : > { %v1221_v28 = vadd.f32 %v4220_v24, %v1092_v41 }
 0x512   : > { %v2459_v52 = vsub.f32 1.0, %v2445_v25  ;;  %v2444_v46 = vadd.f32 %v2436_v7, %v659_v19  ;;  %2453 = vperm.xlu0 %3217, %v2445_v25   ;;  %v1529_v7 = vmul.f32 %v3787_v45, %v1525_v9 }
 0x514   : > { %v2458_v59 = vsub.f32 1.0, %v2444_v46  ;;  %2448 = vperm.xlu1 %3216, %v2444_v46   ;;  %v2461_v1 = vmul.f32 %v2459_v52, %v2162_v56  ;;  %v2477_v57 = vmul.f32 %v2459_v52, %v3918_v38  ;;  %v670_v38 = vld [vmem:[%s4178_s16 + $0x8] sm:$0xff] }
 0x516   : > { %2469 = vperm.xlu0 %3217, %v2461_v1   ;;  %v2460_v29 = vmul.f32 %v2458_v59, %v2155_v37  ;;  %v2476_v4 = vmul.f32 %v2458_v59, %v3920_v18  ;;  %v3136_v18 = vpop.f32.mrf.mxu1  ;;  %v1533_v1 = vmul.f32 %v1529_v7, %v3595_v48  ;;  %v668_v48 = vld [vmem:[%s4177_s15 + $0x8] sm:$0xff] }
 0x517   : > { %v2269_v8 = vadd.f32 %v3136_v18, %v4016_v27 }
 0x518   : > { %2464 = vperm.xlu1 %3216, %v2460_v29   ;;  %v2263_v15 = vpop.f32.mrf.mxu1 }
 0x519   : > { %v2264_v49 = vadd.f32 %v2263_v15, %v4018_v13 }
 0x51a   : > { %2485 = vperm.xlu0 %3217, %v2477_v57   ;;  %v3139_v58 = vpop.f32.mrf.mxu1 }
 0x51b   : > { %v2279_v35 = vadd.f32 %v3139_v58, %v4029_v3 }
 0x51c   : > { %1508 = vperm.xlu1 %3216, %v1498_v20   ;;  %v2273_v14 = vpop.f32.mrf.mxu1  ;;  %v662_v20 = vld [vmem:[%s4174_s12 + $0x8] sm:$0xff] }
 0x51d   : > { %v2274_v21 = vadd.f32 %v2273_v14, %v4039_v26  ;;  %v1493_v26 = vmul.f32 %v4024_v51, %v1221_v28 }
 0x51e   : > { %2480 = vperm.xlu0 %3217, %v2476_v4  }
 0x520   : > { %1503 = vperm.xlu1 %3216, %v1497_v10  }
 0x522   : > { %2506 = vperm.xlu0 %3217, %v669_v54  }
 0x524   : > { %2511 = vperm.xlu1 %3216, %v670_v38  }
 0x58d   : > { %v2454_v22 = vpop.permute.xlu0 %2453 }
 0x58e   : > { %v2457_v34 = vmul.f32 %v2454_v22, %v2269_v8  ;;  %v2475_v13 = vmul.f32 %v2454_v22, %v2279_v35 }
 0x58f   : > { %v2449_v11 = vpop.permute.xlu1 %2448 }
 0x590   : > { %v2456_v33 = vmul.f32 %v2449_v11, %v2264_v49  ;;  %v2474_v16 = vmul.f32 %v2449_v11, %v2274_v21 }
 0x591   : > { %v2470_v36 = vpop.permute.xlu0 %2469 }
 0x592   : > { %v2473_v53 = vadd.f32 %v2470_v36, %v2457_v34 }
 0x593   : > { %v2465_v44 = vpop.permute.xlu1 %2464 }
 0x594   : > { %v2491_v2 = vadd.f32 1.0, %v2473_v53  ;;  %v2472_v27 = vadd.f32 %v2465_v44, %v2456_v33 }
 0x595   : > { %v2486_v19 = vpop.permute.xlu0 %2485 }
 0x596   : > { %v2493_v12 = vmul.f32 %v4047_v39, %v2491_v2  ;;  %v2490_v25 = vadd.f32 1.0, %v2472_v27  ;;  %v2489_v52 = vadd.f32 %v2486_v19, %v2475_v13 }
 0x597   : > { %v1509_v43 = vpop.permute.xlu1 %1508 }
 0x598   : > { %v2492_v32 = vmul.f32 %v4049_v40, %v2490_v25  ;;  %v2495_v3 = vmul.f32 %v2493_v12, %v3924_v62  ;;  %v1522_v46 = vadd.f32 %v1509_v43, %v4043_v6 }
 0x599   : > { %v2481_v55 = vpop.permute.xlu0 %2480 }
 0x59a   : > { %v2497_v56 = vadd.f32 %v2495_v3, %v2489_v52  ;;  %v1538_v17 = vadd.f32 %v1534_v50, %v1522_v46  ;;  %v2494_v39 = vmul.f32 %v2492_v32, %v3935_v0  ;;  %v2488_v59 = vadd.f32 %v2481_v55, %v2474_v16 }
 0x59b   : > { %v1504_v45 = vpop.permute.xlu1 %1503 }
 0x59c   : > { %v2496_v37 = vadd.f32 %v2494_v39, %v2488_v59  ;;  %v1521_v42 = vadd.f32 %v1504_v45, %v1493_v26  ;;  %vm2499_vm7 = vcmp.ge.f32.partialorder %v2497_v56, 0.0  ;;  %v2501_v40 = vmul.f32 0.2, %v2497_v56 }
 0x59d   : > { %vm1542_vm8 = vcmp.ge.f32.partialorder %v1538_v17, 0.0  ;;  %v1546_v62 = vmul.f32 0.2, %v1538_v17  ;;  %v2507_v5 = vpop.permute.xlu0 %2506 }
 0x59e   : > { %v1537_v29 = vadd.f32 %v1533_v1, %v1521_v42  ;;  %v2503_v57 = vsel %vm2499_vm7, %v2497_v56, %v2501_v40  ;;  %vm2498_vm9 = vcmp.ge.f32.partialorder %v2496_v37, 0.0  ;;  %v2500_v6 = vmul.f32 0.2, %v2496_v37 }
 0x59f   : > { %3154 = vmatprep.subr.mxu1 %v2503_v57  ;;  %v1550_v51 = vsel %vm1542_vm8, %v1538_v17, %v1546_v62  ;;  %v2512_v4 = vpop.permute.xlu1 %2511 }
 0x5a0   : > { %3165 = vmatprep.subr.mxu0 %v1550_v51  ;;  %3155 = vmatpush3.msra.mxu1 %v2503_v57  ;;  %v2502_v0 = vsel %vm2498_vm9, %v2496_v37, %v2500_v6  ;;  %vm1541_vm10 = vcmp.ge.f32.partialorder %v1537_v29, 0.0  ;;  %v1545_v63 = vmul.f32 0.2, %v1537_v29 }
 0x5a1   : > { %3166 = vmatpush3.msra.mxu0 %v1550_v51  ;;  %3156 = vmatprep.subr.mxu1 %v2502_v0 }
 0x5a2   : > { %3157 = vmatpush3.msra.mxu1 %v2502_v0  ;;  %v1549_v30 = vsel %vm1541_vm10, %v1537_v29, %v1545_v63 }
 0x5a3   : > { %3159 = vmatmul.mubr.msk.f32.vlgmr.msra.gmra.mxu1 %vm872_vm1, %v668_v48  ;;  %3167 = vmatprep.subr.mxu0 %v1549_v30 }
 0x5a4   : > { %3168 = vmatpush3.msra.mxu0 %v1549_v30 }
 0x5a5   : > { %3170 = vmatmul.mubr.msk.f32.vlgmr.msra.gmra.mxu0 %vm1109_vm2, %v662_v20 }
 0x663   : > { %v3160_v31 = vpop.f32.mrf.mxu1 }
 0x664   : > { %v2592_v10 = vadd.f32 %v3160_v31, %v2512_v4 }
 0x665   : > { %v2586_v54 = vpop.f32.mrf.mxu1  ;;  %v3171_v38 = vpop.f32.mrf.mxu0 }
 0x666   : > { %v2587_v61 = vadd.f32 %v2586_v54, %v2507_v5  ;;  %v2673_v23 = vadd.f32 %v3171_v38, %v2592_v10 }
 0x667   : > { %v2667_v18 = vpop.f32.mrf.mxu0 }
 0x668   : > { %2677 = vst.msk [vmem:[%s554_s27 + $0x8] sm:$0xff] %vm872_vm1, %v2673_v23  ;;  %v2668_v41 = vadd.f32 %v2667_v18, %v2587_v61 }
 0x66a   : > { %2676 = vst.msk [vmem:[%s554_s27] sm:$0xff] %vm872_vm1, %v2668_v41 }
 0x66b   : > { %3243 = shalt.err (!%p3240_p3)
}
 0x66c   : > { %s3244_s24 = scalar_lea.hbm %s4118_s23, 256  ;;  %s3248_s19 = scalar_lea.hbm %s4223_s17, 512 }
 0x66d   : > { %p3245_p4 = scmp.ne.s32.totalorder %s4118_s23, %s3244_s24  ;;  %p3249_p9 = scmp.lt.s32.totalorder %s4118_s23, %s4223_s17 }
 0x66e   : > { %p3250_p10 = scmp.lt.s32.totalorder %s3248_s19, %s3244_s24 }
 0x66f   : > { %p3246_p7 = pnand %p3245_p4, %p3424_p5 }
 0x670   : > { %p3251_p11 = por %p3250_p10, %p3249_p9 }
 0x671   : > { %p3247_p8 = pneg %p3246_p7 }
 0x673   : > { %p3252_p12 = pnand %p3251_p11, %p3247_p8 }
 0x675   : > { %3255 = shalt.err (!%p3252_p12)
}
 0x676   : > { %s3294_s30 = smov 128   ;;  %s3295_s18 = smov 8  }
 0x677   : > { %3174 = dma.vmem_to_hbm [thread:$0]  (%p3424_p5), %s4113_s0, 256, %s4118_s23, %s4122_s29, %s3294_s30, %s3294_s30, %s3295_s18  }
 0x678 PF: > { %s4224_s21 = sld [smem:[#allocation7_spill]] }
 0x679   : > { %s4225_s22 = sld [smem:[#allocation5_spill]] }
 0x67e   : > { %p3180_p13 = scmp.ge.s32.totalorder %s4224_s21, 2 }
 0x67f   : > { %s2707_s27 = sand.u32 1, %s4225_s22  }
 0x680   : > { %p3177_p0 = pnand %p3180_p13, %p3428_p6  ;;  %s2708_s24 = scalar_lea.sflag [#allocation3], %s2707_s27 }
 0x682   : > { %p3178_p1 = pneg %p3177_p0 }
 0x684   : > { %3273 = dma.done.wait (%p3178_p1), %s2708_s24, 256  }
 0x685   : > { %3275 = vsyncadd (%p3178_p1), %s2708_s24, 4294967040  ;;  %s4227_s27 = sld [smem:[#allocation9_spill]]  ;;  %s4230_s24 = smov %s3282_s25 }
 0x686   : > { %s4228_s19 = sld [smem:[#allocation6_spill]] }
 0x687   : > { %s4229_s26 = sld [smem:[#allocation10_spill]] }
 0x68b   : > { %p27_p2 = scmp.ge.s32.totalorder %s4227_s27, 4  }
 0x68c   : > { %s4231_s25 = smov %s4228_s19 }
 0x68d   :  { %29 = sbr.rel (!%p27_p2) target bundleno = 7 (0x7), region = 133 }
 0x692   :  { %2713 = vsyncpa [#allocation3], 1 }
 0x693   :  { %2715 = vsyncpa [#allocation3 + $0x1], 1 }

</bundles_post_ra>
